<compile_context>
chip_gen: v5e
topology: v5e:2x2
jax: 0.10.0
libtpu: 0.0.40
codegen_flags: <defaults>
</compile_context>

<pallas_src>
import functools

import jax
import jax.numpy as jnp
from jax.experimental import pallas as pl
from jax.experimental.pallas import tpu as pltpu


def _heads_kernel(x_ref, w_ref, b_ref, o_ref):
    # Fused matmul for all five heads.  x arrives f32 and is cast to bf16
    # in-register for the MXU fast path; accumulation stays f32; bias row 0 of
    # the sublane-replicated (8, OUT_PAD) tile broadcasts over the TM rows;
    # result is stored in the (narrower) output dtype (bf16 by default).
    acc = jnp.dot(
        x_ref[...].astype(jnp.bfloat16),
        w_ref[...].astype(jnp.bfloat16),
        preferred_element_type=jnp.float32,
    )
    o_ref[...] = (acc + b_ref[0:1, :]).astype(o_ref.dtype)


def _round_up(n, m):
    return ((n + m - 1) // m) * m


@functools.partial(
    jax.jit,
    static_argnames=("num_latents", "num_gaussians", "out_dtype", "min_pallas_rows"),
)
def mdn_heads_forward(
    x,
    w_cat,
    b_cat,
    *,
    num_latents,
    num_gaussians,
    out_dtype=jnp.bfloat16,
    min_pallas_rows=1024,
):
    """Fused MDN-LSTM head projections.

    x:     (..., H) float32 LSTM hidden features.  All leading dims (batch,
           timestep, ...) are flattened into one row axis so an entire rollout
           is a single call.
    w_cat: (H, OUT_PAD) float32 concatenated head weights
           [mu | sigma | md_log_prob | reward | termination | pad].
    b_cat: (8, OUT_PAD) float32 sublane-replicated concatenated head biases.
    """
    *lead, H = x.shape
    M = 1
    for d in lead:
        M *= d
    out_pad = w_cat.shape[1]

    x2 = x.reshape(M, H).astype(jnp.float32)

    if M < min_pallas_rows:
        # Tiny-problem fast path: XLA's fused dot+add beats any hand kernel at
        # this size on every TPU generation (a Pallas launch is pure fixed
        # overhead for ~tens of KB of data).
        out = (x2 @ w_cat + b_cat[0:1, :]).astype(out_dtype)
    else:
        # Row tile: big enough to fully amortize the ~0.35 us per-grid-step
        # cost; at TM=4096 the double-buffered footprint is ~3 MB, far under
        # the 32 MiB scoped VMEM default on all of v5e/v6e/v7x.  Multiple of
        # 16 so bf16 output rows pack full sublanes.
        TM = min(4096, _round_up(M, 16))
        grid = (pl.cdiv(M, TM),)

        out = pl.pallas_call(
            _heads_kernel,
            out_shape=jax.ShapeDtypeStruct((M, out_pad), out_dtype),
            grid=grid,
            in_specs=[
                pl.BlockSpec((TM, H), lambda i: (i, 0)),        # x row tiles (f32)
                pl.BlockSpec((H, out_pad), lambda i: (0, 0)),   # weights, resident
                pl.BlockSpec((8, out_pad), lambda i: (0, 0)),   # bias, resident
            ],
            out_specs=pl.BlockSpec((TM, out_pad), lambda i: (i, 0)),
            compiler_params=pltpu.CompilerParams(
                dimension_semantics=("parallel",),
            ),
        )(x2, w_cat, b_cat)

    lg = num_latents * num_gaussians
    ng = num_gaussians
    mu = out[:, :lg].reshape(*lead, lg)
    sigma = out[:, lg:2 * lg].reshape(*lead, lg)
    md_log_prob = out[:, 2 * lg:2 * lg + ng].reshape(*lead, ng)
    reward = out[:, 2 * lg + ng:2 * lg + ng + 1].reshape(*lead, 1)
    termination = out[:, 2 * lg + ng + 1:2 * lg + ng + 2].reshape(*lead, 1)
    return mu, sigma, md_log_prob, reward, termination


def init_params(key, num_latents, num_actions, num_hiddens, num_gaussians):
    """Deterministic init mimicking torch.nn.Linear default (U[-1/sqrt(in), 1/sqrt(in)]).

    Returns:
      w_cat: (H, OUT_PAD) f32, output axis = [mu | sigma | pi | reward | term | pad].
      b_cat: (8, OUT_PAD) f32, bias replicated along 8 sublanes (full-vreg tile).
    """
    del num_actions  # stored by the torch module but unused in forward
    H = num_hiddens
    sizes = [
        num_latents * num_gaussians,  # mu_layer
        num_latents * num_gaussians,  # sigma_layer
        num_gaussians,                # md_log_prob_layer
        1,                            # reward_layer
        1,                            # termination_prob_layer
    ]
    bound = 1.0 / (H ** 0.5)
    ws, bs = [], []
    for out_dim in sizes:
        key, kw, kb = jax.random.split(key, 3)
        # torch stores (out, in); we build (in, out) directly for x @ W.
        ws.append(jax.random.uniform(kw, (H, out_dim), jnp.float32, -bound, bound))
        bs.append(jax.random.uniform(kb, (out_dim,), jnp.float32, -bound, bound))
    w_cat = jnp.concatenate(ws, axis=1)
    b_cat = jnp.concatenate(bs, axis=0)

    out_total = w_cat.shape[1]
    out_pad = _round_up(out_total, 128)
    w_cat = jnp.pad(w_cat, ((0, 0), (0, out_pad - out_total)))
    b_cat = jnp.pad(b_cat, (0, out_pad - out_total))
    b_cat = jnp.tile(b_cat[None, :], (8, 1))  # sublane-replicated bias tile
    return w_cat, b_cat


if __name__ == "__main__":
    NUM_LATENTS = 8
    NUM_ACTIONS = 4
    NUM_HIDDENS = 32
    NUM_GAUSSIANS = 5

    key = jax.random.PRNGKey(0)
    kx, kx_small, kp = jax.random.split(key, 3)
    w_cat, b_cat = init_params(kp, NUM_LATENTS, NUM_ACTIONS, NUM_HIDDENS, NUM_GAUSSIANS)

    lg = NUM_LATENTS * NUM_GAUSSIANS
    ng = NUM_GAUSSIANS

    def ref_heads(x_in):
        x2 = x_in.reshape(-1, NUM_HIDDENS)
        # Same bf16 operand cast / f32 accumulation as the kernel's MXU path.
        return (
            x2.astype(jnp.bfloat16).astype(jnp.float32)
            @ w_cat.astype(jnp.bfloat16).astype(jnp.float32)
            + b_cat[0]
        )

    # --- Pallas path: a modest rollout, (SEQ, BATCH, H) flattened to M=2048 rows.
    SEQ, BATCH = 64, 32
    x = jax.random.normal(kx, (SEQ, BATCH, NUM_HIDDENS), jnp.float32)
    mu, sigma, md_log_prob, reward, termination = mdn_heads_forward(
        x, w_cat, b_cat, num_latents=NUM_LATENTS, num_gaussians=NUM_GAUSSIANS
    )
    jax.block_until_ready((mu, sigma, md_log_prob, reward, termination))

    assert mu.shape == (SEQ, BATCH, lg)
    assert sigma.shape == (SEQ, BATCH, lg)
    assert md_log_prob.shape == (SEQ, BATCH, ng)
    assert reward.shape == (SEQ, BATCH, 1)
    assert termination.shape == (SEQ, BATCH, 1)

    ref = ref_heads(x)
    got = jnp.concatenate(
        [
            mu.reshape(-1, lg),
            sigma.reshape(-1, lg),
            md_log_prob.reshape(-1, ng),
            reward.reshape(-1, 1),
            termination.reshape(-1, 1),
        ],
        axis=1,
    ).astype(jnp.float32)
    # bf16 output + bf16 MXU operands -> compare with a tolerance covering the
    # final-store rounding and accumulation-order differences.
    assert jnp.allclose(got, ref[:, : 2 * lg + ng + 2], atol=3e-2), (
        jnp.max(jnp.abs(got - ref[:, : 2 * lg + ng + 2]))
    )

    # --- Small-M fast path (below the Pallas threshold): plain fused XLA.
    xs = jax.random.normal(kx_small, (8, 4, NUM_HIDDENS), jnp.float32)
    mu_s, sigma_s, pi_s, r_s, t_s = mdn_heads_forward(
        xs, w_cat, b_cat, num_latents=NUM_LATENTS, num_gaussians=NUM_GAUSSIANS
    )
    jax.block_until_ready((mu_s, sigma_s, pi_s, r_s, t_s))
    ref_s = xs.reshape(-1, NUM_HIDDENS) @ w_cat + b_cat[0]
    got_s = jnp.concatenate(
        [
            mu_s.reshape(-1, lg),
            sigma_s.reshape(-1, lg),
            pi_s.reshape(-1, ng),
            r_s.reshape(-1, 1),
            t_s.reshape(-1, 1),
        ],
        axis=1,
    ).astype(jnp.float32)
    assert jnp.allclose(got_s, ref_s[:, : 2 * lg + ng + 2], atol=3e-2)

    print("KERNEL_OK")
</pallas_src>

<mosaic_0001>
module attributes {stable_mosaic.version = 11 : i64} {
  func.func @_heads_kernel(%arg0: i32, %arg1: memref<2048x32xf32, #tpu.memory_space<vmem>>, %arg2: memref<32x128xf32, #tpu.memory_space<vmem>>, %arg3: memref<8x128xf32, #tpu.memory_space<vmem>>, %arg4: memref<2048x128xbf16, #tpu.memory_space<vmem>>) attributes {dimension_semantics = [#tpu.dimension_semantics<parallel>], iteration_bounds = array<i64: 1>, scalar_prefetch = 0 : i64, scratch_operands = 0 : i64, tpu.core_type = #tpu.core_type<tc>, window_params = [{transform_indices = @transform_0, window_bounds = array<i64: 2048, 32>}, {pipeline_mode = #tpu.pipeline_mode<synchronous>, transform_indices = @transform_1, window_bounds = array<i64: 32, 128>}, {pipeline_mode = #tpu.pipeline_mode<synchronous>, transform_indices = @transform_2, window_bounds = array<i64: 8, 128>}, {transform_indices = @transform_3, window_bounds = array<i64: 2048, 128>}]} {
    %c0 = arith.constant 0 : index
    %c0_0 = arith.constant 0 : index
    %0 = vector.load %arg1[%c0, %c0_0] : memref<2048x32xf32, #tpu.memory_space<vmem>>, vector<2048x32xf32>
    %1 = arith.truncf %0 : vector<2048x32xf32> to vector<2048x32xbf16>
    %c0_1 = arith.constant 0 : index
    %c0_2 = arith.constant 0 : index
    %2 = vector.load %arg2[%c0_1, %c0_2] : memref<32x128xf32, #tpu.memory_space<vmem>>, vector<32x128xf32>
    %3 = arith.truncf %2 : vector<32x128xf32> to vector<32x128xbf16>
    %cst = arith.constant dense<0.000000e+00> : vector<2048x128xf32>
    %4 = tpu.matmul %1, %3, %cst {dimension_numbers = #tpu.dot_dimension_numbers<[1], [0], [0], [1], [0, 0, 1, 1], [], []>} : vector<2048x32xbf16>, vector<32x128xbf16>, vector<2048x128xf32> -> vector<2048x128xf32>
    %c0_3 = arith.constant 0 : index
    %c0_4 = arith.constant 0 : index
    %5 = vector.load %arg3[%c0_3, %c0_4] : memref<8x128xf32, #tpu.memory_space<vmem>>, vector<1x128xf32>
    %6 = vector.broadcast %5 : vector<1x128xf32> to vector<2048x128xf32>
    %7 = arith.addf %4, %6 : vector<2048x128xf32>
    %8 = arith.truncf %7 : vector<2048x128xf32> to vector<2048x128xbf16>
    %c0_5 = arith.constant 0 : index
    %c0_6 = arith.constant 0 : index
    %9 = vector.load %arg4[%c0_5, %c0_6] : memref<2048x128xbf16, #tpu.memory_space<vmem>>, vector<2048x128xbf16>
    tpu.vector_store %arg4[%c0_5, %c0_6], %8 {strides = array<i32>} : memref<2048x128xbf16, #tpu.memory_space<vmem>>, vector<2048x128xbf16>,
    return
  }
  func.func @transform_0(%arg0: i32) -> (i32, i32) {
    %c0_i32 = arith.constant 0 : i32
    %c0_i32_0 = arith.constant 0 : i32
    return %arg0, %c0_i32 : i32, i32
  }
  func.func @transform_1(%arg0: i32) -> (i32, i32) {
    %c0_i32 = arith.constant 0 : i32
    %c0_i32_0 = arith.constant 0 : i32
    %c0_i32_1 = arith.constant 0 : i32
    return %c0_i32, %c0_i32_0 : i32, i32
  }
  func.func @transform_2(%arg0: i32) -> (i32, i32) {
    %c0_i32 = arith.constant 0 : i32
    %c0_i32_0 = arith.constant 0 : i32
    %c0_i32_1 = arith.constant 0 : i32
    return %c0_i32, %c0_i32_0 : i32, i32
  }
  func.func @transform_3(%arg0: i32) -> (i32, i32) {
    %c0_i32 = arith.constant 0 : i32
    %c0_i32_0 = arith.constant 0 : i32
    return %arg0, %c0_i32 : i32, i32
  }
}

</mosaic_0001>

<bundles_post_ra>
// kernel: mdn_heads_forward.1
= control target key start
LH: loop header
LB: loop body
LE: loop exit
PB: predicated region body
PF: predicated region fallthrough
CT: control target
= control target key end

     0   :  { %vm407_vm0 = vcmask 261120   ;;  %s4444_s1 = inlined_call_operand.vmem [shape: f32[32,128], index: 1, kind: input, shape index: {}]   ;;  %s4445_s0 = inlined_call_operand.vmem [shape: f32[2048,32], index: 0, kind: input, shape index: {}]   ;;  %s4446_s2 = inlined_call_operand.vmem [shape: f32[8,128], index: 2, kind: input, shape index: {}]   ;;  %s4447_s3 = inlined_call_operand.vmem [shape: bf16[2048,128], index: 3, kind: output, shape index: {}]  }
   0x1   :  { %v401_v0 = vld [vmem:[%s4444_s1 + $0x10] sm:$0xff]  ;;  %v402_v1 = vld [vmem:[%s4444_s1 + $0x18] sm:$0xff]  ;;  %v399_v2 = vld [vmem:[%s4444_s1] sm:$0xff] }
   0x2   :  { %v404_v3 = vpack.c.bf16 %v402_v1, %v401_v0  ;;  %v400_v4 = vld [vmem:[%s4444_s1 + $0x8] sm:$0xff]  ;;  %v15_v5 = vld [vmem:[%s4445_s0] sm:$0xff]  ;;  %v17_v18 = vld [vmem:[%s4445_s0 + $0x10] sm:$0xff] }
   0x3   :  { %v16_v6 = vld [vmem:[%s4445_s0 + $0x8] sm:$0xff]  ;;  %v403_v7 = vpack.c.bf16 %v400_v4, %v399_v2  ;;  %v79_v8 = vld [vmem:[%s4445_s0 + $0x200] sm:$0xff]  ;;  %v18_v19 = vld [vmem:[%s4445_s0 + $0x18] sm:$0xff] }
   0x4   :  { %798 = vmatpush.bf16.msra.mxu0 %v404_v3  ;;  %2852 = vmatpush.bf16.msra.mxu1 %v404_v3  ;;  %v80_v9 = vld [vmem:[%s4445_s0 + $0x208] sm:$0xff]  ;;  %v143_v10 = vld [vmem:[%s4445_s0 + $0x400] sm:$0xff]  ;;  %v271_v14 = vpack.c.bf16 %v16_v6, %v15_v5  ;;  %v81_v20 = vld [vmem:[%s4445_s0 + $0x210] sm:$0xff]  ;;  %v272_v26 = vpack.c.bf16 %v18_v19, %v17_v18 }
   0x5   :  { %2853 = vmatpush.bf16.msra.mxu2 %v404_v3  ;;  %2854 = vmatpush.bf16.msra.mxu3 %v404_v3  ;;  %v144_v11 = vld [vmem:[%s4445_s0 + $0x408] sm:$0xff]  ;;  %v207_v12 = vld [vmem:[%s4445_s0 + $0x600] sm:$0xff]  ;;  %v303_v15 = vpack.c.bf16 %v80_v9, %v79_v8  ;;  %v82_v21 = vld [vmem:[%s4445_s0 + $0x218] sm:$0xff] }
   0x6   :  { %v208_v13 = vld [vmem:[%s4445_s0 + $0x608] sm:$0xff]  ;;  %v335_v16 = vpack.c.bf16 %v144_v11, %v143_v10  ;;  %v145_v22 = vld [vmem:[%s4445_s0 + $0x410] sm:$0xff]  ;;  %v146_v23 = vld [vmem:[%s4445_s0 + $0x418] sm:$0xff]  ;;  %v304_v27 = vpack.c.bf16 %v82_v21, %v81_v20 }
   0x7   :  { %v367_v17 = vpack.c.bf16 %v208_v13, %v207_v12  ;;  %v209_v24 = vld [vmem:[%s4445_s0 + $0x610] sm:$0xff]  ;;  %v210_v25 = vld [vmem:[%s4445_s0 + $0x618] sm:$0xff]  ;;  %v336_v28 = vpack.c.bf16 %v146_v23, %v145_v22  ;;  %v19_v30 = vld [vmem:[%s4445_s0 + $0x20] sm:$0xff] }
   0x8   :  { %799 = vmatpush.bf16.msra.mxu0 %v403_v7  ;;  %2855 = vmatpush.bf16.msra.mxu1 %v403_v7  ;;  %v368_v29 = vpack.c.bf16 %v210_v25, %v209_v24  ;;  %v20_v31 = vld [vmem:[%s4445_s0 + $0x28] sm:$0xff]  ;;  %v83_v32 = vld [vmem:[%s4445_s0 + $0x220] sm:$0xff]  ;;  %v21_v42 = vld [vmem:[%s4445_s0 + $0x30] sm:$0xff] }
   0x9   :  { %2856 = vmatpush.bf16.msra.mxu2 %v403_v7  ;;  %2857 = vmatpush.bf16.msra.mxu3 %v403_v7  ;;  %v84_v33 = vld [vmem:[%s4445_s0 + $0x228] sm:$0xff]  ;;  %v147_v34 = vld [vmem:[%s4445_s0 + $0x420] sm:$0xff]  ;;  %v273_v38 = vpack.c.bf16 %v20_v31, %v19_v30  ;;  %v22_v43 = vld [vmem:[%s4445_s0 + $0x38] sm:$0xff] }
   0xa   :  { %v148_v35 = vld [vmem:[%s4445_s0 + $0x428] sm:$0xff]  ;;  %v211_v36 = vld [vmem:[%s4445_s0 + $0x620] sm:$0xff]  ;;  %v305_v39 = vpack.c.bf16 %v84_v33, %v83_v32  ;;  %v85_v44 = vld [vmem:[%s4445_s0 + $0x230] sm:$0xff]  ;;  %v274_v50 = vpack.c.bf16 %v22_v43, %v21_v42 }
   0xb   :  { %1957 = vmatmul.msk.bf16.vlgmr.msra.gmra.mxu0 %vm407_vm0, %v271_v14  ;;  %1989 = vmatmul.msk.bf16.vlgmr.msra.gmra.mxu1 %vm407_vm0, %v303_v15  ;;  %v212_v37 = vld [vmem:[%s4445_s0 + $0x628] sm:$0xff]  ;;  %v337_v40 = vpack.c.bf16 %v148_v35, %v147_v34  ;;  %v86_v45 = vld [vmem:[%s4445_s0 + $0x238] sm:$0xff]  ;;  %v149_v46 = vld [vmem:[%s4445_s0 + $0x430] sm:$0xff] }
   0xc   :  { %2021 = vmatmul.msk.bf16.vlgmr.msra.gmra.mxu2 %vm407_vm0, %v335_v16  ;;  %2053 = vmatmul.msk.bf16.vlgmr.msra.gmra.mxu3 %vm407_vm0, %v367_v17  ;;  %v369_v41 = vpack.c.bf16 %v212_v37, %v211_v36  ;;  %v150_v47 = vld [vmem:[%s4445_s0 + $0x438] sm:$0xff]  ;;  %v213_v48 = vld [vmem:[%s4445_s0 + $0x630] sm:$0xff]  ;;  %v306_v51 = vpack.c.bf16 %v86_v45, %v85_v44  ;;  %v23_v54 = vld [vmem:[%s4445_s0 + $0x40] sm:$0xff] }
   0xd   :  { %v214_v49 = vld [vmem:[%s4445_s0 + $0x638] sm:$0xff]  ;;  %v338_v52 = vpack.c.bf16 %v150_v47, %v149_v46  ;;  %v24_v55 = vld [vmem:[%s4445_s0 + $0x48] sm:$0xff]  ;;  %v87_v56 = vld [vmem:[%s4445_s0 + $0x240] sm:$0xff] }
   0xe   :  { %v370_v53 = vpack.c.bf16 %v214_v49, %v213_v48  ;;  %v88_v57 = vld [vmem:[%s4445_s0 + $0x248] sm:$0xff]  ;;  %v151_v58 = vld [vmem:[%s4445_s0 + $0x440] sm:$0xff]  ;;  %v275_v62 = vpack.c.bf16 %v24_v55, %v23_v54  ;;  %v25_v2 = vld [vmem:[%s4445_s0 + $0x50] sm:$0xff] }
   0xf   :  { %v152_v59 = vld [vmem:[%s4445_s0 + $0x448] sm:$0xff]  ;;  %v215_v60 = vld [vmem:[%s4445_s0 + $0x640] sm:$0xff]  ;;  %v307_v63 = vpack.c.bf16 %v88_v57, %v87_v56  ;;  %v26_v3 = vld [vmem:[%s4445_s0 + $0x58] sm:$0xff] }
  0x10   :  { %v216_v61 = vld [vmem:[%s4445_s0 + $0x648] sm:$0xff]  ;;  %v339_v0 = vpack.c.bf16 %v152_v59, %v151_v58  ;;  %v89_v4 = vld [vmem:[%s4445_s0 + $0x250] sm:$0xff]  ;;  %v90_v5 = vld [vmem:[%s4445_s0 + $0x258] sm:$0xff]  ;;  %v276_v10 = vpack.c.bf16 %v26_v3, %v25_v2 }
  0x11   :  { %v371_v1 = vpack.c.bf16 %v216_v61, %v215_v60  ;;  %v153_v6 = vld [vmem:[%s4445_s0 + $0x450] sm:$0xff]  ;;  %v154_v7 = vld [vmem:[%s4445_s0 + $0x458] sm:$0xff]  ;;  %v308_v11 = vpack.c.bf16 %v90_v5, %v89_v4  ;;  %v27_v14 = vld [vmem:[%s4445_s0 + $0x60] sm:$0xff] }
  0x12   :  { %v217_v8 = vld [vmem:[%s4445_s0 + $0x650] sm:$0xff]  ;;  %v218_v9 = vld [vmem:[%s4445_s0 + $0x658] sm:$0xff]  ;;  %v340_v12 = vpack.c.bf16 %v154_v7, %v153_v6  ;;  %v28_v15 = vld [vmem:[%s4445_s0 + $0x68] sm:$0xff] }
  0x13   :  { %v372_v13 = vpack.c.bf16 %v218_v9, %v217_v8  ;;  %v91_v16 = vld [vmem:[%s4445_s0 + $0x260] sm:$0xff]  ;;  %v92_v17 = vld [vmem:[%s4445_s0 + $0x268] sm:$0xff]  ;;  %v277_v22 = vpack.c.bf16 %v28_v15, %v27_v14  ;;  %v157_v30 = vld [vmem:[%s4445_s0 + $0x470] sm:$0xff] }
  0x14   :  { %v155_v18 = vld [vmem:[%s4445_s0 + $0x460] sm:$0xff]  ;;  %v156_v19 = vld [vmem:[%s4445_s0 + $0x468] sm:$0xff]  ;;  %v309_v23 = vpack.c.bf16 %v92_v17, %v91_v16  ;;  %v158_v31 = vld [vmem:[%s4445_s0 + $0x478] sm:$0xff] }
  0x15   :  { %v219_v20 = vld [vmem:[%s4445_s0 + $0x660] sm:$0xff]  ;;  %v220_v21 = vld [vmem:[%s4445_s0 + $0x668] sm:$0xff]  ;;  %v341_v24 = vpack.c.bf16 %v156_v19, %v155_v18  ;;  %v221_v32 = vld [vmem:[%s4445_s0 + $0x670] sm:$0xff]  ;;  %v342_v36 = vpack.c.bf16 %v158_v31, %v157_v30 }
  0x16   :  { %v373_v25 = vpack.c.bf16 %v220_v21, %v219_v20  ;;  %v222_v33 = vld [vmem:[%s4445_s0 + $0x678] sm:$0xff]  ;;  %v159_v42 = vld [vmem:[%s4445_s0 + $0x480] sm:$0xff]  ;;  %v160_v43 = vld [vmem:[%s4445_s0 + $0x488] sm:$0xff] }
  0x17   :  { %v374_v37 = vpack.c.bf16 %v222_v33, %v221_v32  ;;  %v223_v44 = vld [vmem:[%s4445_s0 + $0x680] sm:$0xff]  ;;  %v224_v45 = vld [vmem:[%s4445_s0 + $0x688] sm:$0xff]  ;;  %v33_v61 = vld [vmem:[%s4445_s0 + $0x90] sm:$0xff] }
  0x18   :  { %v98_v2 = vld [vmem:[%s4445_s0 + $0x298] sm:$0xff]  ;;  %v161_v3 = vld [vmem:[%s4445_s0 + $0x490] sm:$0xff]  ;;  %v36_v30 = vld [vmem:[%s4445_s0 + $0xa8] sm:$0xff] }
  0x19   :  { %v162_v4 = vld [vmem:[%s4445_s0 + $0x498] sm:$0xff]  ;;  %v225_v5 = vld [vmem:[%s4445_s0 + $0x690] sm:$0xff]  ;;  %v99_v33 = vld [vmem:[%s4445_s0 + $0x2a0] sm:$0xff] }
  0x1a   :  { %v226_v6 = vld [vmem:[%s4445_s0 + $0x698] sm:$0xff] }
  0x1b   :  { %1958 = vmatmul.msk.bf16.gmra.mxu0 %vm407_vm0, %v272_v26  ;;  %1990 = vmatmul.msk.bf16.gmra.mxu1 %vm407_vm0, %v304_v27  ;;  %v29_v26 = vld [vmem:[%s4445_s0 + $0x70] sm:$0xff]  ;;  %v30_v27 = vld [vmem:[%s4445_s0 + $0x78] sm:$0xff] }
  0x1c   :  { %2022 = vmatmul.msk.bf16.gmra.mxu2 %vm407_vm0, %v336_v28  ;;  %2054 = vmatmul.msk.bf16.gmra.mxu3 %vm407_vm0, %v368_v29  ;;  %v93_v28 = vld [vmem:[%s4445_s0 + $0x270] sm:$0xff]  ;;  %v94_v29 = vld [vmem:[%s4445_s0 + $0x278] sm:$0xff]  ;;  %v278_v34 = vpack.c.bf16 %v30_v27, %v29_v26 }
  0x1d   :  { %v310_v35 = vpack.c.bf16 %v94_v29, %v93_v28  ;;  %v35_v29 = vld [vmem:[%s4445_s0 + $0xa0] sm:$0xff] }
  0x2b   :  { %1959 = vmatmul.msk.bf16.gmra.mxu0 %vm407_vm0, %v273_v38  ;;  %1991 = vmatmul.msk.bf16.gmra.mxu1 %vm407_vm0, %v305_v39  ;;  %v31_v38 = vld [vmem:[%s4445_s0 + $0x80] sm:$0xff]  ;;  %v32_v39 = vld [vmem:[%s4445_s0 + $0x88] sm:$0xff] }
  0x2c   :  { %2023 = vmatmul.msk.bf16.gmra.mxu2 %vm407_vm0, %v337_v40  ;;  %2055 = vmatmul.msk.bf16.gmra.mxu3 %vm407_vm0, %v369_v41  ;;  %v95_v40 = vld [vmem:[%s4445_s0 + $0x280] sm:$0xff]  ;;  %v96_v41 = vld [vmem:[%s4445_s0 + $0x288] sm:$0xff]  ;;  %v279_v46 = vpack.c.bf16 %v32_v39, %v31_v38 }
  0x2d   :  { %v311_v47 = vpack.c.bf16 %v96_v41, %v95_v40  ;;  %v228_v38 = vld [vmem:[%s4445_s0 + $0x6a8] sm:$0xff]  ;;  %v281_v41 = vpack.c.bf16 %v36_v30, %v35_v29  ;;  %v39_v30 = vld [vmem:[%s4445_s0 + $0xc0] sm:$0xff] }
  0x3b   :  { %1960 = vmatmul.msk.bf16.gmra.mxu0 %vm407_vm0, %v274_v50  ;;  %1992 = vmatmul.msk.bf16.gmra.mxu1 %vm407_vm0, %v306_v51  ;;  %v343_v50 = vpack.c.bf16 %v160_v43, %v159_v42  ;;  %v375_v51 = vpack.c.bf16 %v224_v45, %v223_v44 }
  0x3c   :  { %2024 = vmatmul.msk.bf16.gmra.mxu2 %vm407_vm0, %v338_v52  ;;  %2056 = vmatmul.msk.bf16.gmra.mxu3 %vm407_vm0, %v370_v53  ;;  %v3148_v52 = vld [vmem:[%s4446_s2] ss:$0 sm:$0xff] }
  0x4b   :  { %1961 = vmatmul.msk.bf16.gmra.mxu0 %vm407_vm0, %v275_v62  ;;  %1993 = vmatmul.msk.bf16.gmra.mxu1 %vm407_vm0, %v307_v63  ;;  %v34_v62 = vld [vmem:[%s4445_s0 + $0x98] sm:$0xff] }
  0x4c   :  { %2025 = vmatmul.msk.bf16.gmra.mxu2 %vm407_vm0, %v339_v0  ;;  %2057 = vmatmul.msk.bf16.gmra.mxu3 %vm407_vm0, %v371_v1  ;;  %v97_v1 = vld [vmem:[%s4445_s0 + $0x290] sm:$0xff]  ;;  %v280_v9 = vpack.c.bf16 %v34_v62, %v33_v61 }
  0x4d   :  { %v37_v62 = vld [vmem:[%s4445_s0 + $0xb0] sm:$0xff] }
  0x5b   :  { %1962 = vmatmul.msk.bf16.gmra.mxu0 %vm407_vm0, %v276_v10  ;;  %1994 = vmatmul.msk.bf16.gmra.mxu1 %vm407_vm0, %v308_v11  ;;  %v312_v10 = vpack.c.bf16 %v98_v2, %v97_v1  ;;  %v344_v11 = vpack.c.bf16 %v162_v4, %v161_v3  ;;  %v101_v2 = vld [vmem:[%s4445_s0 + $0x2b0] sm:$0xff]  ;;  %v102_v3 = vld [vmem:[%s4445_s0 + $0x2b8] sm:$0xff] }
  0x5c   :  { %2026 = vmatmul.msk.bf16.gmra.mxu2 %vm407_vm0, %v340_v12  ;;  %2058 = vmatmul.msk.bf16.gmra.mxu3 %vm407_vm0, %v372_v13  ;;  %v376_v12 = vpack.c.bf16 %v226_v6, %v225_v5  ;;  %v165_v4 = vld [vmem:[%s4445_s0 + $0x4b0] sm:$0xff]  ;;  %v166_v5 = vld [vmem:[%s4445_s0 + $0x4b8] sm:$0xff] }
  0x5d   :  { %v229_v6 = vld [vmem:[%s4445_s0 + $0x6b0] sm:$0xff] }
  0x6b   :  { %1963 = vmatmul.msk.bf16.gmra.mxu0 %vm407_vm0, %v277_v22  ;;  %1995 = vmatmul.msk.bf16.gmra.mxu1 %vm407_vm0, %v309_v23 }
  0x6c   :  { %2027 = vmatmul.msk.bf16.gmra.mxu2 %vm407_vm0, %v341_v24  ;;  %2059 = vmatmul.msk.bf16.gmra.mxu3 %vm407_vm0, %v373_v25 }
  0x7b   :  { %1964 = vmatmul.msk.bf16.gmra.mxu0 %vm407_vm0, %v278_v34  ;;  %1996 = vmatmul.msk.bf16.gmra.mxu1 %vm407_vm0, %v310_v35  ;;  %v100_v34 = vld [vmem:[%s4445_s0 + $0x2a8] sm:$0xff]  ;;  %v163_v35 = vld [vmem:[%s4445_s0 + $0x4a0] sm:$0xff] }
  0x7c   :  { %2028 = vmatmul.msk.bf16.gmra.mxu2 %vm407_vm0, %v342_v36  ;;  %2060 = vmatmul.msk.bf16.gmra.mxu3 %vm407_vm0, %v374_v37  ;;  %v164_v36 = vld [vmem:[%s4445_s0 + $0x4a8] sm:$0xff]  ;;  %v227_v37 = vld [vmem:[%s4445_s0 + $0x6a0] sm:$0xff]  ;;  %v313_v42 = vpack.c.bf16 %v100_v34, %v99_v33 }
  0x7d   :  { %v345_v43 = vpack.c.bf16 %v164_v36, %v163_v35  ;;  %v377_v44 = vpack.c.bf16 %v228_v38, %v227_v37  ;;  %v103_v34 = vld [vmem:[%s4445_s0 + $0x2c0] sm:$0xff]  ;;  %v104_v35 = vld [vmem:[%s4445_s0 + $0x2c8] sm:$0xff] }
  0x7e   :  { %v167_v36 = vld [vmem:[%s4445_s0 + $0x4c0] sm:$0xff]  ;;  %v168_v37 = vld [vmem:[%s4445_s0 + $0x4c8] sm:$0xff] }
  0x7f   :  { %v231_v38 = vld [vmem:[%s4445_s0 + $0x6c0] sm:$0xff] }
  0x88   :  { %v801_v48 = vpop.f32.mrf.mxu0  ;;  %v961_v49 = vpop.f32.mrf.mxu1 }
  0x89   :  { %v802_v57 = vadd.f32 %v3148_v52, %v801_v48  ;;  %v962_v58 = vadd.f32 %v3148_v52, %v961_v49 }
  0x8b   :  { %1965 = vmatmul.msk.bf16.gmra.mxu0 %vm407_vm0, %v279_v46  ;;  %1997 = vmatmul.msk.bf16.gmra.mxu1 %vm407_vm0, %v311_v47 }
  0x8c   :  { %2029 = vmatmul.msk.bf16.gmra.mxu2 %vm407_vm0, %v343_v50  ;;  %2061 = vmatmul.msk.bf16.gmra.mxu3 %vm407_vm0, %v375_v51 }
  0x8f   :  { %v1121_v53 = vpop.f32.mrf.mxu2  ;;  %v1281_v54 = vpop.f32.mrf.mxu3 }
  0x90   :  { %v803_v55 = vpop.f32.mrf.mxu0  ;;  %v963_v56 = vpop.f32.mrf.mxu1  ;;  %v1122_v13 = vadd.f32 %v3148_v52, %v1121_v53  ;;  %v1282_v14 = vadd.f32 %v3148_v52, %v1281_v54 }
  0x91   :  { %v804_v59 = vadd.f32 %v3148_v52, %v803_v55  ;;  %v964_v60 = vadd.f32 %v3148_v52, %v963_v56 }
  0x93   :  { %v2088_v63 = vpack.c.bf16 %v804_v59, %v802_v57  ;;  %v2248_v0 = vpack.c.bf16 %v964_v60, %v962_v58 }
  0x95   :  { %2089 = vst [vmem:[%s4447_s3] sm:$0xff] %v2088_v63   ;;  %v38_v63 = vld [vmem:[%s4445_s0 + $0xb8] sm:$0xff] }
  0x96   :  { %2756 = vst [vmem:[%s4447_s3 + $0x100] sm:$0xff] %v2248_v0  }
  0x97   :  { %v1123_v7 = vpop.f32.mrf.mxu2  ;;  %v1283_v8 = vpop.f32.mrf.mxu3 }
  0x98   :  { %v1124_v15 = vadd.f32 %v3148_v52, %v1123_v7  ;;  %v1284_v16 = vadd.f32 %v3148_v52, %v1283_v8  ;;  %v806_v17 = vpop.f32.mrf.mxu0  ;;  %v966_v18 = vpop.f32.mrf.mxu1  ;;  %v230_v7 = vld [vmem:[%s4445_s0 + $0x6b8] sm:$0xff] }
  0x99   :  { %v807_v25 = vadd.f32 %v3148_v52, %v806_v17  ;;  %v967_v26 = vadd.f32 %v3148_v52, %v966_v18 }
  0x9a   :  { %v2408_v19 = vpack.c.bf16 %v1124_v15, %v1122_v13  ;;  %v2568_v20 = vpack.c.bf16 %v1284_v16, %v1282_v14  ;;  %v378_v13 = vpack.c.bf16 %v230_v7, %v229_v6  ;;  %v170_v6 = vld [vmem:[%s4445_s0 + $0x4d8] sm:$0xff]  ;;  %v233_v7 = vld [vmem:[%s4445_s0 + $0x6d0] sm:$0xff] }
  0x9b   :  { %1966 = vmatmul.msk.bf16.gmra.mxu0 %vm407_vm0, %v280_v9  ;;  %1998 = vmatmul.msk.bf16.gmra.mxu1 %vm407_vm0, %v312_v10  ;;  %v282_v10 = vpack.c.bf16 %v38_v63, %v37_v62  ;;  %v41_v63 = vld [vmem:[%s4445_s0 + $0xd0] sm:$0xff] }
  0x9c   :  { %2788 = vst [vmem:[%s4447_s3 + $0x200] sm:$0xff] %v2408_v19   ;;  %2030 = vmatmul.msk.bf16.gmra.mxu2 %vm407_vm0, %v344_v11  ;;  %2062 = vmatmul.msk.bf16.gmra.mxu3 %vm407_vm0, %v376_v12  ;;  %v314_v11 = vpack.c.bf16 %v102_v3, %v101_v2  ;;  %v346_v12 = vpack.c.bf16 %v166_v5, %v165_v4  ;;  %v105_v3 = vld [vmem:[%s4445_s0 + $0x2d0] sm:$0xff]  ;;  %v106_v4 = vld [vmem:[%s4445_s0 + $0x2d8] sm:$0xff] }
  0x9d   :  { %2820 = vst [vmem:[%s4447_s3 + $0x300] sm:$0xff] %v2568_v20   ;;  %v169_v5 = vld [vmem:[%s4445_s0 + $0x4d0] sm:$0xff] }
  0x9f   :  { %v1126_v21 = vpop.f32.mrf.mxu2  ;;  %v1286_v22 = vpop.f32.mrf.mxu3 }
  0xa0   :  { %v808_v23 = vpop.f32.mrf.mxu0  ;;  %v968_v24 = vpop.f32.mrf.mxu1  ;;  %v1127_v45 = vadd.f32 %v3148_v52, %v1126_v21  ;;  %v1287_v46 = vadd.f32 %v3148_v52, %v1286_v22 }
  0xa1   :  { %v809_v27 = vadd.f32 %v3148_v52, %v808_v23  ;;  %v969_v28 = vadd.f32 %v3148_v52, %v968_v24 }
  0xa3   :  { %v2093_v31 = vpack.c.bf16 %v809_v27, %v807_v25  ;;  %v2253_v32 = vpack.c.bf16 %v969_v28, %v967_v26 }
  0xa5   :  { %2725 = vst [vmem:[%s4447_s3 + $0x8] sm:$0xff] %v2093_v31   ;;  %v40_v31 = vld [vmem:[%s4445_s0 + $0xc8] sm:$0xff] }
  0xa6   :  { %2757 = vst [vmem:[%s4447_s3 + $0x108] sm:$0xff] %v2253_v32  }
  0xa7   :  { %v1128_v39 = vpop.f32.mrf.mxu2  ;;  %v1288_v40 = vpop.f32.mrf.mxu3 }
  0xa8   :  { %v1129_v47 = vadd.f32 %v3148_v52, %v1128_v39  ;;  %v1289_v48 = vadd.f32 %v3148_v52, %v1288_v40  ;;  %v811_v49 = vpop.f32.mrf.mxu0  ;;  %v971_v50 = vpop.f32.mrf.mxu1  ;;  %v232_v39 = vld [vmem:[%s4445_s0 + $0x6c8] sm:$0xff] }
  0xa9   :  { %v812_v58 = vadd.f32 %v3148_v52, %v811_v49  ;;  %v972_v59 = vadd.f32 %v3148_v52, %v971_v50 }
  0xaa   :  { %v2413_v51 = vpack.c.bf16 %v1129_v47, %v1127_v45  ;;  %v2573_v53 = vpack.c.bf16 %v1289_v48, %v1287_v46  ;;  %v379_v45 = vpack.c.bf16 %v232_v39, %v231_v38  ;;  %v172_v38 = vld [vmem:[%s4445_s0 + $0x4e8] sm:$0xff]  ;;  %v235_v39 = vld [vmem:[%s4445_s0 + $0x6e0] sm:$0xff] }
  0xab   :  { %1967 = vmatmul.msk.bf16.gmra.mxu0 %vm407_vm0, %v281_v41  ;;  %1999 = vmatmul.msk.bf16.gmra.mxu1 %vm407_vm0, %v313_v42  ;;  %v283_v42 = vpack.c.bf16 %v40_v31, %v39_v30  ;;  %v43_v31 = vld [vmem:[%s4445_s0 + $0xe0] sm:$0xff] }
  0xac   :  { %2789 = vst [vmem:[%s4447_s3 + $0x208] sm:$0xff] %v2413_v51   ;;  %2031 = vmatmul.msk.bf16.gmra.mxu2 %vm407_vm0, %v345_v43  ;;  %2063 = vmatmul.msk.bf16.gmra.mxu3 %vm407_vm0, %v377_v44  ;;  %v315_v43 = vpack.c.bf16 %v104_v35, %v103_v34  ;;  %v347_v44 = vpack.c.bf16 %v168_v37, %v167_v36  ;;  %v107_v35 = vld [vmem:[%s4445_s0 + $0x2e0] sm:$0xff]  ;;  %v108_v36 = vld [vmem:[%s4445_s0 + $0x2e8] sm:$0xff] }
  0xad   :  { %2821 = vst [vmem:[%s4447_s3 + $0x308] sm:$0xff] %v2573_v53   ;;  %v171_v37 = vld [vmem:[%s4445_s0 + $0x4e0] sm:$0xff] }
  0xaf   :  { %v1131_v54 = vpop.f32.mrf.mxu2  ;;  %v1291_v55 = vpop.f32.mrf.mxu3 }
  0xb0   :  { %v813_v56 = vpop.f32.mrf.mxu0  ;;  %v973_v57 = vpop.f32.mrf.mxu1  ;;  %v1132_v14 = vadd.f32 %v3148_v52, %v1131_v54  ;;  %v1292_v15 = vadd.f32 %v3148_v52, %v1291_v55 }
  0xb1   :  { %v814_v60 = vadd.f32 %v3148_v52, %v813_v56  ;;  %v974_v61 = vadd.f32 %v3148_v52, %v973_v57 }
  0xb3   :  { %v2098_v0 = vpack.c.bf16 %v814_v60, %v812_v58  ;;  %v2258_v1 = vpack.c.bf16 %v974_v61, %v972_v59 }
  0xb5   :  { %2726 = vst [vmem:[%s4447_s3 + $0x10] sm:$0xff] %v2098_v0   ;;  %v42_v0 = vld [vmem:[%s4445_s0 + $0xd8] sm:$0xff] }
  0xb6   :  { %2758 = vst [vmem:[%s4447_s3 + $0x110] sm:$0xff] %v2258_v1  }
  0xb7   :  { %v1133_v8 = vpop.f32.mrf.mxu2  ;;  %v1293_v9 = vpop.f32.mrf.mxu3 }
  0xb8   :  { %v1134_v16 = vadd.f32 %v3148_v52, %v1133_v8  ;;  %v1294_v17 = vadd.f32 %v3148_v52, %v1293_v9  ;;  %v816_v18 = vpop.f32.mrf.mxu0  ;;  %v976_v19 = vpop.f32.mrf.mxu1  ;;  %v234_v8 = vld [vmem:[%s4445_s0 + $0x6d8] sm:$0xff] }
  0xb9   :  { %v817_v26 = vadd.f32 %v3148_v52, %v816_v18  ;;  %v977_v27 = vadd.f32 %v3148_v52, %v976_v19 }
  0xba   :  { %v2418_v20 = vpack.c.bf16 %v1134_v16, %v1132_v14  ;;  %v2578_v21 = vpack.c.bf16 %v1294_v17, %v1292_v15  ;;  %v380_v14 = vpack.c.bf16 %v234_v8, %v233_v7  ;;  %v174_v7 = vld [vmem:[%s4445_s0 + $0x4f8] sm:$0xff]  ;;  %v237_v8 = vld [vmem:[%s4445_s0 + $0x6f0] sm:$0xff] }
  0xbb   :  { %1968 = vmatmul.msk.bf16.gmra.mxu0 %vm407_vm0, %v282_v10  ;;  %2000 = vmatmul.msk.bf16.gmra.mxu1 %vm407_vm0, %v314_v11  ;;  %v284_v11 = vpack.c.bf16 %v42_v0, %v41_v63  ;;  %v45_v0 = vld [vmem:[%s4445_s0 + $0xf0] sm:$0xff] }
  0xbc   :  { %2790 = vst [vmem:[%s4447_s3 + $0x210] sm:$0xff] %v2418_v20   ;;  %2032 = vmatmul.msk.bf16.gmra.mxu2 %vm407_vm0, %v346_v12  ;;  %2064 = vmatmul.msk.bf16.gmra.mxu3 %vm407_vm0, %v378_v13  ;;  %v316_v12 = vpack.c.bf16 %v106_v4, %v105_v3  ;;  %v348_v13 = vpack.c.bf16 %v170_v6, %v169_v5  ;;  %v109_v4 = vld [vmem:[%s4445_s0 + $0x2f0] sm:$0xff]  ;;  %v110_v5 = vld [vmem:[%s4445_s0 + $0x2f8] sm:$0xff] }
  0xbd   :  { %2822 = vst [vmem:[%s4447_s3 + $0x310] sm:$0xff] %v2578_v21   ;;  %v173_v6 = vld [vmem:[%s4445_s0 + $0x4f0] sm:$0xff] }
  0xbf   :  { %v1136_v22 = vpop.f32.mrf.mxu2  ;;  %v1296_v23 = vpop.f32.mrf.mxu3 }
  0xc0   :  { %v818_v24 = vpop.f32.mrf.mxu0  ;;  %v978_v25 = vpop.f32.mrf.mxu1  ;;  %v1137_v46 = vadd.f32 %v3148_v52, %v1136_v22  ;;  %v1297_v47 = vadd.f32 %v3148_v52, %v1296_v23 }
  0xc1   :  { %v819_v28 = vadd.f32 %v3148_v52, %v818_v24  ;;  %v979_v29 = vadd.f32 %v3148_v52, %v978_v25 }
  0xc3   :  { %v2103_v32 = vpack.c.bf16 %v819_v28, %v817_v26  ;;  %v2263_v33 = vpack.c.bf16 %v979_v29, %v977_v27 }
  0xc5   :  { %2727 = vst [vmem:[%s4447_s3 + $0x18] sm:$0xff] %v2103_v32   ;;  %v44_v32 = vld [vmem:[%s4445_s0 + $0xe8] sm:$0xff] }
  0xc6   :  { %2759 = vst [vmem:[%s4447_s3 + $0x118] sm:$0xff] %v2263_v33  }
  0xc7   :  { %v1138_v40 = vpop.f32.mrf.mxu2  ;;  %v1298_v41 = vpop.f32.mrf.mxu3 }
  0xc8   :  { %v1139_v48 = vadd.f32 %v3148_v52, %v1138_v40  ;;  %v1299_v49 = vadd.f32 %v3148_v52, %v1298_v41  ;;  %v821_v50 = vpop.f32.mrf.mxu0  ;;  %v981_v51 = vpop.f32.mrf.mxu1  ;;  %v236_v40 = vld [vmem:[%s4445_s0 + $0x6e8] sm:$0xff] }
  0xc9   :  { %v822_v59 = vadd.f32 %v3148_v52, %v821_v50  ;;  %v982_v60 = vadd.f32 %v3148_v52, %v981_v51 }
  0xca   :  { %v2423_v53 = vpack.c.bf16 %v1139_v48, %v1137_v46  ;;  %v2583_v54 = vpack.c.bf16 %v1299_v49, %v1297_v47  ;;  %v381_v46 = vpack.c.bf16 %v236_v40, %v235_v39  ;;  %v176_v39 = vld [vmem:[%s4445_s0 + $0x508] sm:$0xff]  ;;  %v239_v40 = vld [vmem:[%s4445_s0 + $0x700] sm:$0xff] }
  0xcb   :  { %1969 = vmatmul.msk.bf16.gmra.mxu0 %vm407_vm0, %v283_v42  ;;  %2001 = vmatmul.msk.bf16.gmra.mxu1 %vm407_vm0, %v315_v43  ;;  %v285_v43 = vpack.c.bf16 %v44_v32, %v43_v31  ;;  %v47_v32 = vld [vmem:[%s4445_s0 + $0x100] sm:$0xff] }
  0xcc   :  { %2791 = vst [vmem:[%s4447_s3 + $0x218] sm:$0xff] %v2423_v53   ;;  %2033 = vmatmul.msk.bf16.gmra.mxu2 %vm407_vm0, %v347_v44  ;;  %2065 = vmatmul.msk.bf16.gmra.mxu3 %vm407_vm0, %v379_v45  ;;  %v317_v44 = vpack.c.bf16 %v108_v36, %v107_v35  ;;  %v349_v45 = vpack.c.bf16 %v172_v38, %v171_v37  ;;  %v111_v36 = vld [vmem:[%s4445_s0 + $0x300] sm:$0xff]  ;;  %v112_v37 = vld [vmem:[%s4445_s0 + $0x308] sm:$0xff] }
  0xcd   :  { %2823 = vst [vmem:[%s4447_s3 + $0x318] sm:$0xff] %v2583_v54   ;;  %v175_v38 = vld [vmem:[%s4445_s0 + $0x500] sm:$0xff] }
  0xcf   :  { %v1141_v55 = vpop.f32.mrf.mxu2  ;;  %v1301_v56 = vpop.f32.mrf.mxu3 }
  0xd0   :  { %v823_v57 = vpop.f32.mrf.mxu0  ;;  %v983_v58 = vpop.f32.mrf.mxu1  ;;  %v1142_v15 = vadd.f32 %v3148_v52, %v1141_v55  ;;  %v1302_v16 = vadd.f32 %v3148_v52, %v1301_v56 }
  0xd1   :  { %v824_v61 = vadd.f32 %v3148_v52, %v823_v57  ;;  %v984_v62 = vadd.f32 %v3148_v52, %v983_v58 }
  0xd3   :  { %v2108_v1 = vpack.c.bf16 %v824_v61, %v822_v59  ;;  %v2268_v2 = vpack.c.bf16 %v984_v62, %v982_v60 }
  0xd5   :  { %2728 = vst [vmem:[%s4447_s3 + $0x20] sm:$0xff] %v2108_v1   ;;  %v46_v1 = vld [vmem:[%s4445_s0 + $0xf8] sm:$0xff] }
  0xd6   :  { %2760 = vst [vmem:[%s4447_s3 + $0x120] sm:$0xff] %v2268_v2  }
  0xd7   :  { %v1143_v9 = vpop.f32.mrf.mxu2  ;;  %v1303_v10 = vpop.f32.mrf.mxu3 }
  0xd8   :  { %v1144_v17 = vadd.f32 %v3148_v52, %v1143_v9  ;;  %v1304_v18 = vadd.f32 %v3148_v52, %v1303_v10  ;;  %v826_v19 = vpop.f32.mrf.mxu0  ;;  %v986_v20 = vpop.f32.mrf.mxu1  ;;  %v238_v9 = vld [vmem:[%s4445_s0 + $0x6f8] sm:$0xff] }
  0xd9   :  { %v827_v27 = vadd.f32 %v3148_v52, %v826_v19  ;;  %v987_v28 = vadd.f32 %v3148_v52, %v986_v20 }
  0xda   :  { %v2428_v21 = vpack.c.bf16 %v1144_v17, %v1142_v15  ;;  %v2588_v22 = vpack.c.bf16 %v1304_v18, %v1302_v16  ;;  %v382_v15 = vpack.c.bf16 %v238_v9, %v237_v8  ;;  %v178_v8 = vld [vmem:[%s4445_s0 + $0x518] sm:$0xff]  ;;  %v241_v9 = vld [vmem:[%s4445_s0 + $0x710] sm:$0xff] }
  0xdb   :  { %1970 = vmatmul.msk.bf16.gmra.mxu0 %vm407_vm0, %v284_v11  ;;  %2002 = vmatmul.msk.bf16.gmra.mxu1 %vm407_vm0, %v316_v12  ;;  %v286_v12 = vpack.c.bf16 %v46_v1, %v45_v0  ;;  %v49_v1 = vld [vmem:[%s4445_s0 + $0x110] sm:$0xff] }
  0xdc   :  { %2792 = vst [vmem:[%s4447_s3 + $0x220] sm:$0xff] %v2428_v21   ;;  %2034 = vmatmul.msk.bf16.gmra.mxu2 %vm407_vm0, %v348_v13  ;;  %2066 = vmatmul.msk.bf16.gmra.mxu3 %vm407_vm0, %v380_v14  ;;  %v318_v13 = vpack.c.bf16 %v110_v5, %v109_v4  ;;  %v350_v14 = vpack.c.bf16 %v174_v7, %v173_v6  ;;  %v113_v5 = vld [vmem:[%s4445_s0 + $0x310] sm:$0xff]  ;;  %v114_v6 = vld [vmem:[%s4445_s0 + $0x318] sm:$0xff] }
  0xdd   :  { %2824 = vst [vmem:[%s4447_s3 + $0x320] sm:$0xff] %v2588_v22   ;;  %v177_v7 = vld [vmem:[%s4445_s0 + $0x510] sm:$0xff] }
  0xdf   :  { %v1146_v23 = vpop.f32.mrf.mxu2  ;;  %v1306_v24 = vpop.f32.mrf.mxu3 }
  0xe0   :  { %v828_v25 = vpop.f32.mrf.mxu0  ;;  %v988_v26 = vpop.f32.mrf.mxu1  ;;  %v1147_v47 = vadd.f32 %v3148_v52, %v1146_v23  ;;  %v1307_v48 = vadd.f32 %v3148_v52, %v1306_v24 }
  0xe1   :  { %v829_v29 = vadd.f32 %v3148_v52, %v828_v25  ;;  %v989_v30 = vadd.f32 %v3148_v52, %v988_v26 }
  0xe3   :  { %v2113_v33 = vpack.c.bf16 %v829_v29, %v827_v27  ;;  %v2273_v34 = vpack.c.bf16 %v989_v30, %v987_v28 }
  0xe5   :  { %2729 = vst [vmem:[%s4447_s3 + $0x28] sm:$0xff] %v2113_v33   ;;  %v48_v33 = vld [vmem:[%s4445_s0 + $0x108] sm:$0xff] }
  0xe6   :  { %2761 = vst [vmem:[%s4447_s3 + $0x128] sm:$0xff] %v2273_v34  }
  0xe7   :  { %v1148_v41 = vpop.f32.mrf.mxu2  ;;  %v1308_v42 = vpop.f32.mrf.mxu3 }
  0xe8   :  { %v1149_v49 = vadd.f32 %v3148_v52, %v1148_v41  ;;  %v1309_v50 = vadd.f32 %v3148_v52, %v1308_v42  ;;  %v831_v51 = vpop.f32.mrf.mxu0  ;;  %v991_v53 = vpop.f32.mrf.mxu1  ;;  %v240_v41 = vld [vmem:[%s4445_s0 + $0x708] sm:$0xff] }
  0xe9   :  { %v832_v60 = vadd.f32 %v3148_v52, %v831_v51  ;;  %v992_v61 = vadd.f32 %v3148_v52, %v991_v53 }
  0xea   :  { %v2433_v54 = vpack.c.bf16 %v1149_v49, %v1147_v47  ;;  %v2593_v55 = vpack.c.bf16 %v1309_v50, %v1307_v48  ;;  %v383_v47 = vpack.c.bf16 %v240_v41, %v239_v40  ;;  %v180_v40 = vld [vmem:[%s4445_s0 + $0x528] sm:$0xff]  ;;  %v243_v41 = vld [vmem:[%s4445_s0 + $0x720] sm:$0xff] }
  0xeb   :  { %1971 = vmatmul.msk.bf16.gmra.mxu0 %vm407_vm0, %v285_v43  ;;  %2003 = vmatmul.msk.bf16.gmra.mxu1 %vm407_vm0, %v317_v44  ;;  %v287_v44 = vpack.c.bf16 %v48_v33, %v47_v32  ;;  %v51_v33 = vld [vmem:[%s4445_s0 + $0x120] sm:$0xff] }
  0xec   :  { %2793 = vst [vmem:[%s4447_s3 + $0x228] sm:$0xff] %v2433_v54   ;;  %2035 = vmatmul.msk.bf16.gmra.mxu2 %vm407_vm0, %v349_v45  ;;  %2067 = vmatmul.msk.bf16.gmra.mxu3 %vm407_vm0, %v381_v46  ;;  %v319_v45 = vpack.c.bf16 %v112_v37, %v111_v36  ;;  %v351_v46 = vpack.c.bf16 %v176_v39, %v175_v38  ;;  %v115_v37 = vld [vmem:[%s4445_s0 + $0x320] sm:$0xff]  ;;  %v116_v38 = vld [vmem:[%s4445_s0 + $0x328] sm:$0xff] }
  0xed   :  { %2825 = vst [vmem:[%s4447_s3 + $0x328] sm:$0xff] %v2593_v55   ;;  %v179_v39 = vld [vmem:[%s4445_s0 + $0x520] sm:$0xff] }
  0xef   :  { %v1151_v56 = vpop.f32.mrf.mxu2  ;;  %v1311_v57 = vpop.f32.mrf.mxu3 }
  0xf0   :  { %v833_v58 = vpop.f32.mrf.mxu0  ;;  %v993_v59 = vpop.f32.mrf.mxu1  ;;  %v1152_v16 = vadd.f32 %v3148_v52, %v1151_v56  ;;  %v1312_v17 = vadd.f32 %v3148_v52, %v1311_v57 }
  0xf1   :  { %v834_v62 = vadd.f32 %v3148_v52, %v833_v58  ;;  %v994_v63 = vadd.f32 %v3148_v52, %v993_v59 }
  0xf3   :  { %v2118_v2 = vpack.c.bf16 %v834_v62, %v832_v60  ;;  %v2278_v3 = vpack.c.bf16 %v994_v63, %v992_v61 }
  0xf5   :  { %2730 = vst [vmem:[%s4447_s3 + $0x30] sm:$0xff] %v2118_v2   ;;  %v50_v2 = vld [vmem:[%s4445_s0 + $0x118] sm:$0xff] }
  0xf6   :  { %2762 = vst [vmem:[%s4447_s3 + $0x130] sm:$0xff] %v2278_v3  }
  0xf7   :  { %v1153_v10 = vpop.f32.mrf.mxu2  ;;  %v1313_v11 = vpop.f32.mrf.mxu3 }
  0xf8   :  { %v1154_v18 = vadd.f32 %v3148_v52, %v1153_v10  ;;  %v1314_v19 = vadd.f32 %v3148_v52, %v1313_v11  ;;  %v836_v20 = vpop.f32.mrf.mxu0  ;;  %v996_v21 = vpop.f32.mrf.mxu1  ;;  %v242_v10 = vld [vmem:[%s4445_s0 + $0x718] sm:$0xff] }
  0xf9   :  { %v837_v28 = vadd.f32 %v3148_v52, %v836_v20  ;;  %v997_v29 = vadd.f32 %v3148_v52, %v996_v21 }
  0xfa   :  { %v2438_v22 = vpack.c.bf16 %v1154_v18, %v1152_v16  ;;  %v2598_v23 = vpack.c.bf16 %v1314_v19, %v1312_v17  ;;  %v384_v16 = vpack.c.bf16 %v242_v10, %v241_v9  ;;  %v182_v9 = vld [vmem:[%s4445_s0 + $0x538] sm:$0xff]  ;;  %v245_v10 = vld [vmem:[%s4445_s0 + $0x730] sm:$0xff] }
  0xfb   :  { %1972 = vmatmul.msk.bf16.gmra.mxu0 %vm407_vm0, %v286_v12  ;;  %2004 = vmatmul.msk.bf16.gmra.mxu1 %vm407_vm0, %v318_v13  ;;  %v288_v13 = vpack.c.bf16 %v50_v2, %v49_v1  ;;  %v53_v2 = vld [vmem:[%s4445_s0 + $0x130] sm:$0xff] }
  0xfc   :  { %2794 = vst [vmem:[%s4447_s3 + $0x230] sm:$0xff] %v2438_v22   ;;  %2036 = vmatmul.msk.bf16.gmra.mxu2 %vm407_vm0, %v350_v14  ;;  %2068 = vmatmul.msk.bf16.gmra.mxu3 %vm407_vm0, %v382_v15  ;;  %v320_v14 = vpack.c.bf16 %v114_v6, %v113_v5  ;;  %v352_v15 = vpack.c.bf16 %v178_v8, %v177_v7  ;;  %v117_v6 = vld [vmem:[%s4445_s0 + $0x330] sm:$0xff]  ;;  %v118_v7 = vld [vmem:[%s4445_s0 + $0x338] sm:$0xff] }
  0xfd   :  { %2826 = vst [vmem:[%s4447_s3 + $0x330] sm:$0xff] %v2598_v23   ;;  %v181_v8 = vld [vmem:[%s4445_s0 + $0x530] sm:$0xff] }
  0xff   :  { %v1156_v24 = vpop.f32.mrf.mxu2  ;;  %v1316_v25 = vpop.f32.mrf.mxu3 }
 0x100   :  { %v838_v26 = vpop.f32.mrf.mxu0  ;;  %v998_v27 = vpop.f32.mrf.mxu1  ;;  %v1157_v48 = vadd.f32 %v3148_v52, %v1156_v24  ;;  %v1317_v49 = vadd.f32 %v3148_v52, %v1316_v25 }
 0x101   :  { %v839_v30 = vadd.f32 %v3148_v52, %v838_v26  ;;  %v999_v31 = vadd.f32 %v3148_v52, %v998_v27 }
 0x103   :  { %v2123_v34 = vpack.c.bf16 %v839_v30, %v837_v28  ;;  %v2283_v35 = vpack.c.bf16 %v999_v31, %v997_v29 }
 0x105   :  { %2731 = vst [vmem:[%s4447_s3 + $0x38] sm:$0xff] %v2123_v34   ;;  %v52_v34 = vld [vmem:[%s4445_s0 + $0x128] sm:$0xff] }
 0x106   :  { %2763 = vst [vmem:[%s4447_s3 + $0x138] sm:$0xff] %v2283_v35  }
 0x107   :  { %v1158_v42 = vpop.f32.mrf.mxu2  ;;  %v1318_v43 = vpop.f32.mrf.mxu3 }
 0x108   :  { %v1159_v50 = vadd.f32 %v3148_v52, %v1158_v42  ;;  %v1319_v51 = vadd.f32 %v3148_v52, %v1318_v43  ;;  %v841_v53 = vpop.f32.mrf.mxu0  ;;  %v1001_v54 = vpop.f32.mrf.mxu1  ;;  %v244_v42 = vld [vmem:[%s4445_s0 + $0x728] sm:$0xff] }
 0x109   :  { %v842_v61 = vadd.f32 %v3148_v52, %v841_v53  ;;  %v1002_v62 = vadd.f32 %v3148_v52, %v1001_v54 }
 0x10a   :  { %v2443_v55 = vpack.c.bf16 %v1159_v50, %v1157_v48  ;;  %v2603_v56 = vpack.c.bf16 %v1319_v51, %v1317_v49  ;;  %v385_v48 = vpack.c.bf16 %v244_v42, %v243_v41  ;;  %v184_v41 = vld [vmem:[%s4445_s0 + $0x548] sm:$0xff]  ;;  %v247_v42 = vld [vmem:[%s4445_s0 + $0x740] sm:$0xff] }
 0x10b   :  { %1973 = vmatmul.msk.bf16.gmra.mxu0 %vm407_vm0, %v287_v44  ;;  %2005 = vmatmul.msk.bf16.gmra.mxu1 %vm407_vm0, %v319_v45  ;;  %v289_v45 = vpack.c.bf16 %v52_v34, %v51_v33  ;;  %v55_v34 = vld [vmem:[%s4445_s0 + $0x140] sm:$0xff] }
 0x10c   :  { %2795 = vst [vmem:[%s4447_s3 + $0x238] sm:$0xff] %v2443_v55   ;;  %2037 = vmatmul.msk.bf16.gmra.mxu2 %vm407_vm0, %v351_v46  ;;  %2069 = vmatmul.msk.bf16.gmra.mxu3 %vm407_vm0, %v383_v47  ;;  %v321_v46 = vpack.c.bf16 %v116_v38, %v115_v37  ;;  %v353_v47 = vpack.c.bf16 %v180_v40, %v179_v39  ;;  %v119_v38 = vld [vmem:[%s4445_s0 + $0x340] sm:$0xff]  ;;  %v120_v39 = vld [vmem:[%s4445_s0 + $0x348] sm:$0xff] }
 0x10d   :  { %2827 = vst [vmem:[%s4447_s3 + $0x338] sm:$0xff] %v2603_v56   ;;  %v183_v40 = vld [vmem:[%s4445_s0 + $0x540] sm:$0xff] }
 0x10f   :  { %v1161_v57 = vpop.f32.mrf.mxu2  ;;  %v1321_v58 = vpop.f32.mrf.mxu3 }
 0x110   :  { %v843_v59 = vpop.f32.mrf.mxu0  ;;  %v1003_v60 = vpop.f32.mrf.mxu1  ;;  %v1162_v17 = vadd.f32 %v3148_v52, %v1161_v57  ;;  %v1322_v18 = vadd.f32 %v3148_v52, %v1321_v58 }
 0x111   :  { %v844_v63 = vadd.f32 %v3148_v52, %v843_v59  ;;  %v1004_v0 = vadd.f32 %v3148_v52, %v1003_v60 }
 0x113   :  { %v2128_v3 = vpack.c.bf16 %v844_v63, %v842_v61  ;;  %v2288_v4 = vpack.c.bf16 %v1004_v0, %v1002_v62 }
 0x115   :  { %2732 = vst [vmem:[%s4447_s3 + $0x40] sm:$0xff] %v2128_v3   ;;  %v54_v3 = vld [vmem:[%s4445_s0 + $0x138] sm:$0xff] }
 0x116   :  { %2764 = vst [vmem:[%s4447_s3 + $0x140] sm:$0xff] %v2288_v4  }
 0x117   :  { %v1163_v11 = vpop.f32.mrf.mxu2  ;;  %v1323_v12 = vpop.f32.mrf.mxu3 }
 0x118   :  { %v1164_v19 = vadd.f32 %v3148_v52, %v1163_v11  ;;  %v1324_v20 = vadd.f32 %v3148_v52, %v1323_v12  ;;  %v846_v21 = vpop.f32.mrf.mxu0  ;;  %v1006_v22 = vpop.f32.mrf.mxu1  ;;  %v246_v11 = vld [vmem:[%s4445_s0 + $0x738] sm:$0xff] }
 0x119   :  { %v847_v29 = vadd.f32 %v3148_v52, %v846_v21  ;;  %v1007_v30 = vadd.f32 %v3148_v52, %v1006_v22 }
 0x11a   :  { %v2448_v23 = vpack.c.bf16 %v1164_v19, %v1162_v17  ;;  %v2608_v24 = vpack.c.bf16 %v1324_v20, %v1322_v18  ;;  %v386_v17 = vpack.c.bf16 %v246_v11, %v245_v10  ;;  %v186_v10 = vld [vmem:[%s4445_s0 + $0x558] sm:$0xff]  ;;  %v249_v11 = vld [vmem:[%s4445_s0 + $0x750] sm:$0xff] }
 0x11b   :  { %1974 = vmatmul.msk.bf16.gmra.mxu0 %vm407_vm0, %v288_v13  ;;  %2006 = vmatmul.msk.bf16.gmra.mxu1 %vm407_vm0, %v320_v14  ;;  %v290_v14 = vpack.c.bf16 %v54_v3, %v53_v2  ;;  %v57_v3 = vld [vmem:[%s4445_s0 + $0x150] sm:$0xff] }
 0x11c   :  { %2796 = vst [vmem:[%s4447_s3 + $0x240] sm:$0xff] %v2448_v23   ;;  %2038 = vmatmul.msk.bf16.gmra.mxu2 %vm407_vm0, %v352_v15  ;;  %2070 = vmatmul.msk.bf16.gmra.mxu3 %vm407_vm0, %v384_v16  ;;  %v322_v15 = vpack.c.bf16 %v118_v7, %v117_v6  ;;  %v354_v16 = vpack.c.bf16 %v182_v9, %v181_v8  ;;  %v121_v7 = vld [vmem:[%s4445_s0 + $0x350] sm:$0xff]  ;;  %v122_v8 = vld [vmem:[%s4445_s0 + $0x358] sm:$0xff] }
 0x11d   :  { %2828 = vst [vmem:[%s4447_s3 + $0x340] sm:$0xff] %v2608_v24   ;;  %v185_v9 = vld [vmem:[%s4445_s0 + $0x550] sm:$0xff] }
 0x11f   :  { %v1166_v25 = vpop.f32.mrf.mxu2  ;;  %v1326_v26 = vpop.f32.mrf.mxu3 }
 0x120   :  { %v848_v27 = vpop.f32.mrf.mxu0  ;;  %v1008_v28 = vpop.f32.mrf.mxu1  ;;  %v1167_v49 = vadd.f32 %v3148_v52, %v1166_v25  ;;  %v1327_v50 = vadd.f32 %v3148_v52, %v1326_v26 }
 0x121   :  { %v849_v31 = vadd.f32 %v3148_v52, %v848_v27  ;;  %v1009_v32 = vadd.f32 %v3148_v52, %v1008_v28 }
 0x123   :  { %v2133_v35 = vpack.c.bf16 %v849_v31, %v847_v29  ;;  %v2293_v36 = vpack.c.bf16 %v1009_v32, %v1007_v30 }
 0x125   :  { %2733 = vst [vmem:[%s4447_s3 + $0x48] sm:$0xff] %v2133_v35   ;;  %v56_v35 = vld [vmem:[%s4445_s0 + $0x148] sm:$0xff] }
 0x126   :  { %2765 = vst [vmem:[%s4447_s3 + $0x148] sm:$0xff] %v2293_v36  }
 0x127   :  { %v1168_v43 = vpop.f32.mrf.mxu2  ;;  %v1328_v44 = vpop.f32.mrf.mxu3 }
 0x128   :  { %v1169_v51 = vadd.f32 %v3148_v52, %v1168_v43  ;;  %v1329_v53 = vadd.f32 %v3148_v52, %v1328_v44  ;;  %v851_v54 = vpop.f32.mrf.mxu0  ;;  %v1011_v55 = vpop.f32.mrf.mxu1  ;;  %v248_v43 = vld [vmem:[%s4445_s0 + $0x748] sm:$0xff] }
 0x129   :  { %v852_v62 = vadd.f32 %v3148_v52, %v851_v54  ;;  %v1012_v63 = vadd.f32 %v3148_v52, %v1011_v55 }
 0x12a   :  { %v2453_v56 = vpack.c.bf16 %v1169_v51, %v1167_v49  ;;  %v2613_v57 = vpack.c.bf16 %v1329_v53, %v1327_v50  ;;  %v387_v49 = vpack.c.bf16 %v248_v43, %v247_v42  ;;  %v188_v42 = vld [vmem:[%s4445_s0 + $0x568] sm:$0xff]  ;;  %v251_v43 = vld [vmem:[%s4445_s0 + $0x760] sm:$0xff] }
 0x12b   :  { %1975 = vmatmul.msk.bf16.gmra.mxu0 %vm407_vm0, %v289_v45  ;;  %2007 = vmatmul.msk.bf16.gmra.mxu1 %vm407_vm0, %v321_v46  ;;  %v291_v46 = vpack.c.bf16 %v56_v35, %v55_v34  ;;  %v59_v35 = vld [vmem:[%s4445_s0 + $0x160] sm:$0xff] }
 0x12c   :  { %2797 = vst [vmem:[%s4447_s3 + $0x248] sm:$0xff] %v2453_v56   ;;  %2039 = vmatmul.msk.bf16.gmra.mxu2 %vm407_vm0, %v353_v47  ;;  %2071 = vmatmul.msk.bf16.gmra.mxu3 %vm407_vm0, %v385_v48  ;;  %v323_v47 = vpack.c.bf16 %v120_v39, %v119_v38  ;;  %v355_v48 = vpack.c.bf16 %v184_v41, %v183_v40  ;;  %v123_v39 = vld [vmem:[%s4445_s0 + $0x360] sm:$0xff]  ;;  %v124_v40 = vld [vmem:[%s4445_s0 + $0x368] sm:$0xff] }
 0x12d   :  { %2829 = vst [vmem:[%s4447_s3 + $0x348] sm:$0xff] %v2613_v57   ;;  %v187_v41 = vld [vmem:[%s4445_s0 + $0x560] sm:$0xff] }
 0x12f   :  { %v1171_v58 = vpop.f32.mrf.mxu2  ;;  %v1331_v59 = vpop.f32.mrf.mxu3 }
 0x130   :  { %v853_v60 = vpop.f32.mrf.mxu0  ;;  %v1013_v61 = vpop.f32.mrf.mxu1  ;;  %v1172_v18 = vadd.f32 %v3148_v52, %v1171_v58  ;;  %v1332_v19 = vadd.f32 %v3148_v52, %v1331_v59 }
 0x131   :  { %v854_v0 = vadd.f32 %v3148_v52, %v853_v60  ;;  %v1014_v1 = vadd.f32 %v3148_v52, %v1013_v61 }
 0x133   :  { %v2138_v4 = vpack.c.bf16 %v854_v0, %v852_v62  ;;  %v2298_v5 = vpack.c.bf16 %v1014_v1, %v1012_v63 }
 0x135   :  { %2734 = vst [vmem:[%s4447_s3 + $0x50] sm:$0xff] %v2138_v4   ;;  %v58_v4 = vld [vmem:[%s4445_s0 + $0x158] sm:$0xff] }
 0x136   :  { %2766 = vst [vmem:[%s4447_s3 + $0x150] sm:$0xff] %v2298_v5  }
 0x137   :  { %v1173_v12 = vpop.f32.mrf.mxu2  ;;  %v1333_v13 = vpop.f32.mrf.mxu3 }
 0x138   :  { %v1174_v20 = vadd.f32 %v3148_v52, %v1173_v12  ;;  %v1334_v21 = vadd.f32 %v3148_v52, %v1333_v13  ;;  %v856_v22 = vpop.f32.mrf.mxu0  ;;  %v1016_v23 = vpop.f32.mrf.mxu1  ;;  %v250_v12 = vld [vmem:[%s4445_s0 + $0x758] sm:$0xff] }
 0x139   :  { %v857_v30 = vadd.f32 %v3148_v52, %v856_v22  ;;  %v1017_v31 = vadd.f32 %v3148_v52, %v1016_v23 }
 0x13a   :  { %v2458_v24 = vpack.c.bf16 %v1174_v20, %v1172_v18  ;;  %v2618_v25 = vpack.c.bf16 %v1334_v21, %v1332_v19  ;;  %v388_v18 = vpack.c.bf16 %v250_v12, %v249_v11  ;;  %v190_v11 = vld [vmem:[%s4445_s0 + $0x578] sm:$0xff]  ;;  %v253_v12 = vld [vmem:[%s4445_s0 + $0x770] sm:$0xff] }
 0x13b   :  { %1976 = vmatmul.msk.bf16.gmra.mxu0 %vm407_vm0, %v290_v14  ;;  %2008 = vmatmul.msk.bf16.gmra.mxu1 %vm407_vm0, %v322_v15  ;;  %v292_v15 = vpack.c.bf16 %v58_v4, %v57_v3  ;;  %v61_v4 = vld [vmem:[%s4445_s0 + $0x170] sm:$0xff] }
 0x13c   :  { %2798 = vst [vmem:[%s4447_s3 + $0x250] sm:$0xff] %v2458_v24   ;;  %2040 = vmatmul.msk.bf16.gmra.mxu2 %vm407_vm0, %v354_v16  ;;  %2072 = vmatmul.msk.bf16.gmra.mxu3 %vm407_vm0, %v386_v17  ;;  %v324_v16 = vpack.c.bf16 %v122_v8, %v121_v7  ;;  %v356_v17 = vpack.c.bf16 %v186_v10, %v185_v9  ;;  %v125_v8 = vld [vmem:[%s4445_s0 + $0x370] sm:$0xff]  ;;  %v126_v9 = vld [vmem:[%s4445_s0 + $0x378] sm:$0xff] }
 0x13d   :  { %2830 = vst [vmem:[%s4447_s3 + $0x350] sm:$0xff] %v2618_v25   ;;  %v189_v10 = vld [vmem:[%s4445_s0 + $0x570] sm:$0xff] }
 0x13f   :  { %v1176_v26 = vpop.f32.mrf.mxu2  ;;  %v1336_v27 = vpop.f32.mrf.mxu3 }
 0x140   :  { %v858_v28 = vpop.f32.mrf.mxu0  ;;  %v1018_v29 = vpop.f32.mrf.mxu1  ;;  %v1177_v50 = vadd.f32 %v3148_v52, %v1176_v26  ;;  %v1337_v51 = vadd.f32 %v3148_v52, %v1336_v27 }
 0x141   :  { %v859_v32 = vadd.f32 %v3148_v52, %v858_v28  ;;  %v1019_v33 = vadd.f32 %v3148_v52, %v1018_v29 }
 0x143   :  { %v2143_v36 = vpack.c.bf16 %v859_v32, %v857_v30  ;;  %v2303_v37 = vpack.c.bf16 %v1019_v33, %v1017_v31  ;;  %v3777_v30 = vld [vmem:[%s4446_s2] ss:$0 sm:$0xff] }
 0x145   :  { %2735 = vst [vmem:[%s4447_s3 + $0x58] sm:$0xff] %v2143_v36   ;;  %v60_v36 = vld [vmem:[%s4445_s0 + $0x168] sm:$0xff] }
 0x146   :  { %2767 = vst [vmem:[%s4447_s3 + $0x158] sm:$0xff] %v2303_v37  }
 0x147   :  { %v1178_v44 = vpop.f32.mrf.mxu2  ;;  %v1338_v45 = vpop.f32.mrf.mxu3 }
 0x148   :  { %v1179_v53 = vadd.f32 %v3148_v52, %v1178_v44  ;;  %v1339_v54 = vadd.f32 %v3148_v52, %v1338_v45  ;;  %v861_v55 = vpop.f32.mrf.mxu0  ;;  %v1021_v56 = vpop.f32.mrf.mxu1  ;;  %v252_v44 = vld [vmem:[%s4445_s0 + $0x768] sm:$0xff] }
 0x149   :  { %v862_v63 = vadd.f32 %v3148_v52, %v861_v55  ;;  %v1022_v0 = vadd.f32 %v3148_v52, %v1021_v56 }
 0x14a   :  { %v2463_v57 = vpack.c.bf16 %v1179_v53, %v1177_v50  ;;  %v2623_v58 = vpack.c.bf16 %v1339_v54, %v1337_v51  ;;  %v389_v50 = vpack.c.bf16 %v252_v44, %v251_v43  ;;  %v192_v43 = vld [vmem:[%s4445_s0 + $0x588] sm:$0xff]  ;;  %v255_v44 = vld [vmem:[%s4445_s0 + $0x780] sm:$0xff] }
 0x14b   :  { %1977 = vmatmul.msk.bf16.gmra.mxu0 %vm407_vm0, %v291_v46  ;;  %2009 = vmatmul.msk.bf16.gmra.mxu1 %vm407_vm0, %v323_v47  ;;  %v293_v47 = vpack.c.bf16 %v60_v36, %v59_v35  ;;  %v63_v36 = vld [vmem:[%s4445_s0 + $0x180] sm:$0xff] }
 0x14c   :  { %2799 = vst [vmem:[%s4447_s3 + $0x258] sm:$0xff] %v2463_v57   ;;  %2041 = vmatmul.msk.bf16.gmra.mxu2 %vm407_vm0, %v355_v48  ;;  %2073 = vmatmul.msk.bf16.gmra.mxu3 %vm407_vm0, %v387_v49  ;;  %v325_v48 = vpack.c.bf16 %v124_v40, %v123_v39  ;;  %v357_v49 = vpack.c.bf16 %v188_v42, %v187_v41  ;;  %v127_v40 = vld [vmem:[%s4445_s0 + $0x380] sm:$0xff]  ;;  %v128_v41 = vld [vmem:[%s4445_s0 + $0x388] sm:$0xff] }
 0x14d   :  { %2831 = vst [vmem:[%s4447_s3 + $0x358] sm:$0xff] %v2623_v58   ;;  %v191_v42 = vld [vmem:[%s4445_s0 + $0x580] sm:$0xff] }
 0x14f   :  { %v1181_v59 = vpop.f32.mrf.mxu2  ;;  %v1341_v60 = vpop.f32.mrf.mxu3 }
 0x150   :  { %v863_v61 = vpop.f32.mrf.mxu0  ;;  %v1023_v62 = vpop.f32.mrf.mxu1  ;;  %v1182_v19 = vadd.f32 %v3148_v52, %v1181_v59  ;;  %v1342_v20 = vadd.f32 %v3148_v52, %v1341_v60 }
 0x151   :  { %v864_v1 = vadd.f32 %v3148_v52, %v863_v61  ;;  %v1024_v2 = vadd.f32 %v3148_v52, %v1023_v62 }
 0x153   :  { %v2148_v5 = vpack.c.bf16 %v864_v1, %v862_v63  ;;  %v2308_v6 = vpack.c.bf16 %v1024_v2, %v1022_v0 }
 0x155   :  { %2736 = vst [vmem:[%s4447_s3 + $0x60] sm:$0xff] %v2148_v5   ;;  %v62_v5 = vld [vmem:[%s4445_s0 + $0x178] sm:$0xff] }
 0x156   :  { %2768 = vst [vmem:[%s4447_s3 + $0x160] sm:$0xff] %v2308_v6  }
 0x157   :  { %v1183_v13 = vpop.f32.mrf.mxu2  ;;  %v1343_v14 = vpop.f32.mrf.mxu3 }
 0x158   :  { %v1184_v21 = vadd.f32 %v3148_v52, %v1183_v13  ;;  %v1344_v22 = vadd.f32 %v3148_v52, %v1343_v14  ;;  %v866_v23 = vpop.f32.mrf.mxu0  ;;  %v1026_v24 = vpop.f32.mrf.mxu1  ;;  %v254_v13 = vld [vmem:[%s4445_s0 + $0x778] sm:$0xff] }
 0x159   :  { %v867_v31 = vadd.f32 %v3777_v30, %v866_v23  ;;  %v1027_v32 = vadd.f32 %v3777_v30, %v1026_v24 }
 0x15a   :  { %v2468_v25 = vpack.c.bf16 %v1184_v21, %v1182_v19  ;;  %v2628_v26 = vpack.c.bf16 %v1344_v22, %v1342_v20  ;;  %v390_v19 = vpack.c.bf16 %v254_v13, %v253_v12  ;;  %v194_v12 = vld [vmem:[%s4445_s0 + $0x598] sm:$0xff]  ;;  %v257_v13 = vld [vmem:[%s4445_s0 + $0x790] sm:$0xff] }
 0x15b   :  { %1978 = vmatmul.msk.bf16.gmra.mxu0 %vm407_vm0, %v292_v15  ;;  %2010 = vmatmul.msk.bf16.gmra.mxu1 %vm407_vm0, %v324_v16  ;;  %v294_v16 = vpack.c.bf16 %v62_v5, %v61_v4  ;;  %v65_v5 = vld [vmem:[%s4445_s0 + $0x190] sm:$0xff] }
 0x15c   :  { %2800 = vst [vmem:[%s4447_s3 + $0x260] sm:$0xff] %v2468_v25   ;;  %2042 = vmatmul.msk.bf16.gmra.mxu2 %vm407_vm0, %v356_v17  ;;  %2074 = vmatmul.msk.bf16.gmra.mxu3 %vm407_vm0, %v388_v18  ;;  %v326_v17 = vpack.c.bf16 %v126_v9, %v125_v8  ;;  %v358_v18 = vpack.c.bf16 %v190_v11, %v189_v10  ;;  %v129_v9 = vld [vmem:[%s4445_s0 + $0x390] sm:$0xff]  ;;  %v130_v10 = vld [vmem:[%s4445_s0 + $0x398] sm:$0xff] }
 0x15d   :  { %2832 = vst [vmem:[%s4447_s3 + $0x360] sm:$0xff] %v2628_v26   ;;  %v193_v11 = vld [vmem:[%s4445_s0 + $0x590] sm:$0xff] }
 0x15f   :  { %v1186_v52 = vpop.f32.mrf.mxu2  ;;  %v1346_v27 = vpop.f32.mrf.mxu3 }
 0x160   :  { %v868_v28 = vpop.f32.mrf.mxu0  ;;  %v1028_v29 = vpop.f32.mrf.mxu1  ;;  %v1187_v51 = vadd.f32 %v3777_v30, %v1186_v52  ;;  %v1347_v53 = vadd.f32 %v3777_v30, %v1346_v27 }
 0x161   :  { %v869_v33 = vadd.f32 %v3777_v30, %v868_v28  ;;  %v1029_v34 = vadd.f32 %v3777_v30, %v1028_v29 }
 0x163   :  { %v2153_v37 = vpack.c.bf16 %v869_v33, %v867_v31  ;;  %v2313_v38 = vpack.c.bf16 %v1029_v34, %v1027_v32 }
 0x165   :  { %2737 = vst [vmem:[%s4447_s3 + $0x68] sm:$0xff] %v2153_v37   ;;  %v64_v37 = vld [vmem:[%s4445_s0 + $0x188] sm:$0xff] }
 0x166   :  { %2769 = vst [vmem:[%s4447_s3 + $0x168] sm:$0xff] %v2313_v38  }
 0x167   :  { %v1188_v45 = vpop.f32.mrf.mxu2  ;;  %v1348_v46 = vpop.f32.mrf.mxu3 }
 0x168   :  { %v1189_v54 = vadd.f32 %v3777_v30, %v1188_v45  ;;  %v1349_v55 = vadd.f32 %v3777_v30, %v1348_v46  ;;  %v871_v56 = vpop.f32.mrf.mxu0  ;;  %v1031_v57 = vpop.f32.mrf.mxu1  ;;  %v256_v45 = vld [vmem:[%s4445_s0 + $0x788] sm:$0xff] }
 0x169   :  { %v872_v0 = vadd.f32 %v3777_v30, %v871_v56  ;;  %v1032_v1 = vadd.f32 %v3777_v30, %v1031_v57 }
 0x16a   :  { %v2473_v58 = vpack.c.bf16 %v1189_v54, %v1187_v51  ;;  %v2633_v59 = vpack.c.bf16 %v1349_v55, %v1347_v53  ;;  %v391_v51 = vpack.c.bf16 %v256_v45, %v255_v44  ;;  %v196_v44 = vld [vmem:[%s4445_s0 + $0x5a8] sm:$0xff]  ;;  %v259_v45 = vld [vmem:[%s4445_s0 + $0x7a0] sm:$0xff] }
 0x16b   :  { %1979 = vmatmul.msk.bf16.gmra.mxu0 %vm407_vm0, %v293_v47  ;;  %2011 = vmatmul.msk.bf16.gmra.mxu1 %vm407_vm0, %v325_v48  ;;  %v295_v48 = vpack.c.bf16 %v64_v37, %v63_v36  ;;  %v67_v37 = vld [vmem:[%s4445_s0 + $0x1a0] sm:$0xff] }
 0x16c   :  { %2801 = vst [vmem:[%s4447_s3 + $0x268] sm:$0xff] %v2473_v58   ;;  %2043 = vmatmul.msk.bf16.gmra.mxu2 %vm407_vm0, %v357_v49  ;;  %2075 = vmatmul.msk.bf16.gmra.mxu3 %vm407_vm0, %v389_v50  ;;  %v327_v49 = vpack.c.bf16 %v128_v41, %v127_v40  ;;  %v359_v50 = vpack.c.bf16 %v192_v43, %v191_v42  ;;  %v131_v41 = vld [vmem:[%s4445_s0 + $0x3a0] sm:$0xff]  ;;  %v132_v42 = vld [vmem:[%s4445_s0 + $0x3a8] sm:$0xff] }
 0x16d   :  { %2833 = vst [vmem:[%s4447_s3 + $0x368] sm:$0xff] %v2633_v59   ;;  %v195_v43 = vld [vmem:[%s4445_s0 + $0x5a0] sm:$0xff] }
 0x16f   :  { %v1191_v60 = vpop.f32.mrf.mxu2  ;;  %v1351_v61 = vpop.f32.mrf.mxu3 }
 0x170   :  { %v873_v62 = vpop.f32.mrf.mxu0  ;;  %v1033_v63 = vpop.f32.mrf.mxu1  ;;  %v1192_v20 = vadd.f32 %v3777_v30, %v1191_v60  ;;  %v1352_v21 = vadd.f32 %v3777_v30, %v1351_v61 }
 0x171   :  { %v874_v2 = vadd.f32 %v3777_v30, %v873_v62  ;;  %v1034_v3 = vadd.f32 %v3777_v30, %v1033_v63 }
 0x173   :  { %v2158_v6 = vpack.c.bf16 %v874_v2, %v872_v0  ;;  %v2318_v7 = vpack.c.bf16 %v1034_v3, %v1032_v1 }
 0x175   :  { %2738 = vst [vmem:[%s4447_s3 + $0x70] sm:$0xff] %v2158_v6   ;;  %v66_v6 = vld [vmem:[%s4445_s0 + $0x198] sm:$0xff] }
 0x176   :  { %2770 = vst [vmem:[%s4447_s3 + $0x170] sm:$0xff] %v2318_v7  }
 0x177   :  { %v1193_v14 = vpop.f32.mrf.mxu2  ;;  %v1353_v15 = vpop.f32.mrf.mxu3 }
 0x178   :  { %v1194_v22 = vadd.f32 %v3777_v30, %v1193_v14  ;;  %v1354_v23 = vadd.f32 %v3777_v30, %v1353_v15  ;;  %v876_v24 = vpop.f32.mrf.mxu0  ;;  %v1036_v25 = vpop.f32.mrf.mxu1  ;;  %v258_v14 = vld [vmem:[%s4445_s0 + $0x798] sm:$0xff] }
 0x179   :  { %v877_v32 = vadd.f32 %v3777_v30, %v876_v24  ;;  %v1037_v33 = vadd.f32 %v3777_v30, %v1036_v25 }
 0x17a   :  { %v2478_v26 = vpack.c.bf16 %v1194_v22, %v1192_v20  ;;  %v2638_v52 = vpack.c.bf16 %v1354_v23, %v1352_v21  ;;  %v392_v20 = vpack.c.bf16 %v258_v14, %v257_v13  ;;  %v198_v13 = vld [vmem:[%s4445_s0 + $0x5b8] sm:$0xff]  ;;  %v261_v14 = vld [vmem:[%s4445_s0 + $0x7b0] sm:$0xff] }
 0x17b   :  { %1980 = vmatmul.msk.bf16.gmra.mxu0 %vm407_vm0, %v294_v16  ;;  %2012 = vmatmul.msk.bf16.gmra.mxu1 %vm407_vm0, %v326_v17  ;;  %v296_v17 = vpack.c.bf16 %v66_v6, %v65_v5  ;;  %v69_v6 = vld [vmem:[%s4445_s0 + $0x1b0] sm:$0xff] }
 0x17c   :  { %2802 = vst [vmem:[%s4447_s3 + $0x270] sm:$0xff] %v2478_v26   ;;  %2044 = vmatmul.msk.bf16.gmra.mxu2 %vm407_vm0, %v358_v18  ;;  %2076 = vmatmul.msk.bf16.gmra.mxu3 %vm407_vm0, %v390_v19  ;;  %v328_v18 = vpack.c.bf16 %v130_v10, %v129_v9  ;;  %v360_v19 = vpack.c.bf16 %v194_v12, %v193_v11  ;;  %v133_v10 = vld [vmem:[%s4445_s0 + $0x3b0] sm:$0xff]  ;;  %v134_v11 = vld [vmem:[%s4445_s0 + $0x3b8] sm:$0xff] }
 0x17d   :  { %2834 = vst [vmem:[%s4447_s3 + $0x370] sm:$0xff] %v2638_v52   ;;  %v197_v12 = vld [vmem:[%s4445_s0 + $0x5b0] sm:$0xff] }
 0x17f   :  { %v1196_v27 = vpop.f32.mrf.mxu2  ;;  %v1356_v28 = vpop.f32.mrf.mxu3 }
 0x180   :  { %v878_v29 = vpop.f32.mrf.mxu0  ;;  %v1038_v31 = vpop.f32.mrf.mxu1  ;;  %v1197_v53 = vadd.f32 %v3777_v30, %v1196_v27  ;;  %v1357_v54 = vadd.f32 %v3777_v30, %v1356_v28 }
 0x181   :  { %v879_v34 = vadd.f32 %v3777_v30, %v878_v29  ;;  %v1039_v35 = vadd.f32 %v3777_v30, %v1038_v31 }
 0x183   :  { %v2163_v38 = vpack.c.bf16 %v879_v34, %v877_v32  ;;  %v2323_v39 = vpack.c.bf16 %v1039_v35, %v1037_v33 }
 0x185   :  { %2739 = vst [vmem:[%s4447_s3 + $0x78] sm:$0xff] %v2163_v38   ;;  %v68_v38 = vld [vmem:[%s4445_s0 + $0x1a8] sm:$0xff] }
 0x186   :  { %2771 = vst [vmem:[%s4447_s3 + $0x178] sm:$0xff] %v2323_v39  }
 0x187   :  { %v1198_v46 = vpop.f32.mrf.mxu2  ;;  %v1358_v47 = vpop.f32.mrf.mxu3 }
 0x188   :  { %v1199_v55 = vadd.f32 %v3777_v30, %v1198_v46  ;;  %v1359_v56 = vadd.f32 %v3777_v30, %v1358_v47  ;;  %v881_v57 = vpop.f32.mrf.mxu0  ;;  %v1041_v58 = vpop.f32.mrf.mxu1  ;;  %v260_v46 = vld [vmem:[%s4445_s0 + $0x7a8] sm:$0xff] }
 0x189   :  { %v882_v1 = vadd.f32 %v3777_v30, %v881_v57  ;;  %v1042_v2 = vadd.f32 %v3777_v30, %v1041_v58 }
 0x18a   :  { %v2483_v59 = vpack.c.bf16 %v1199_v55, %v1197_v53  ;;  %v2643_v60 = vpack.c.bf16 %v1359_v56, %v1357_v54  ;;  %v393_v53 = vpack.c.bf16 %v260_v46, %v259_v45  ;;  %v200_v45 = vld [vmem:[%s4445_s0 + $0x5c8] sm:$0xff]  ;;  %v263_v46 = vld [vmem:[%s4445_s0 + $0x7c0] sm:$0xff] }
 0x18b   :  { %1981 = vmatmul.msk.bf16.gmra.mxu0 %vm407_vm0, %v295_v48  ;;  %2013 = vmatmul.msk.bf16.gmra.mxu1 %vm407_vm0, %v327_v49  ;;  %v297_v49 = vpack.c.bf16 %v68_v38, %v67_v37  ;;  %v71_v38 = vld [vmem:[%s4445_s0 + $0x1c0] sm:$0xff] }
 0x18c   :  { %2803 = vst [vmem:[%s4447_s3 + $0x278] sm:$0xff] %v2483_v59   ;;  %2045 = vmatmul.msk.bf16.gmra.mxu2 %vm407_vm0, %v359_v50  ;;  %2077 = vmatmul.msk.bf16.gmra.mxu3 %vm407_vm0, %v391_v51  ;;  %v329_v50 = vpack.c.bf16 %v132_v42, %v131_v41  ;;  %v361_v51 = vpack.c.bf16 %v196_v44, %v195_v43  ;;  %v135_v42 = vld [vmem:[%s4445_s0 + $0x3c0] sm:$0xff]  ;;  %v136_v43 = vld [vmem:[%s4445_s0 + $0x3c8] sm:$0xff] }
 0x18d   :  { %2835 = vst [vmem:[%s4447_s3 + $0x378] sm:$0xff] %v2643_v60   ;;  %v199_v44 = vld [vmem:[%s4445_s0 + $0x5c0] sm:$0xff] }
 0x18f   :  { %v1201_v61 = vpop.f32.mrf.mxu2  ;;  %v1361_v62 = vpop.f32.mrf.mxu3 }
 0x190   :  { %v883_v63 = vpop.f32.mrf.mxu0  ;;  %v1043_v0 = vpop.f32.mrf.mxu1  ;;  %v1202_v21 = vadd.f32 %v3777_v30, %v1201_v61  ;;  %v1362_v22 = vadd.f32 %v3777_v30, %v1361_v62 }
 0x191   :  { %v884_v3 = vadd.f32 %v3777_v30, %v883_v63  ;;  %v1044_v4 = vadd.f32 %v3777_v30, %v1043_v0 }
 0x193   :  { %v2168_v7 = vpack.c.bf16 %v884_v3, %v882_v1  ;;  %v2328_v8 = vpack.c.bf16 %v1044_v4, %v1042_v2 }
 0x195   :  { %2740 = vst [vmem:[%s4447_s3 + $0x80] sm:$0xff] %v2168_v7   ;;  %v70_v7 = vld [vmem:[%s4445_s0 + $0x1b8] sm:$0xff] }
 0x196   :  { %2772 = vst [vmem:[%s4447_s3 + $0x180] sm:$0xff] %v2328_v8  }
 0x197   :  { %v1203_v15 = vpop.f32.mrf.mxu2  ;;  %v1363_v16 = vpop.f32.mrf.mxu3 }
 0x198   :  { %v1204_v23 = vadd.f32 %v3777_v30, %v1203_v15  ;;  %v1364_v24 = vadd.f32 %v3777_v30, %v1363_v16  ;;  %v886_v25 = vpop.f32.mrf.mxu0  ;;  %v1046_v26 = vpop.f32.mrf.mxu1  ;;  %v262_v15 = vld [vmem:[%s4445_s0 + $0x7b8] sm:$0xff] }
 0x199   :  { %v887_v33 = vadd.f32 %v3777_v30, %v886_v25  ;;  %v1047_v34 = vadd.f32 %v3777_v30, %v1046_v26 }
 0x19a   :  { %v2488_v52 = vpack.c.bf16 %v1204_v23, %v1202_v21  ;;  %v2648_v27 = vpack.c.bf16 %v1364_v24, %v1362_v22  ;;  %v394_v21 = vpack.c.bf16 %v262_v15, %v261_v14  ;;  %v202_v14 = vld [vmem:[%s4445_s0 + $0x5d8] sm:$0xff]  ;;  %v265_v15 = vld [vmem:[%s4445_s0 + $0x7d0] sm:$0xff] }
 0x19b   :  { %1982 = vmatmul.msk.bf16.gmra.mxu0 %vm407_vm0, %v296_v17  ;;  %2014 = vmatmul.msk.bf16.gmra.mxu1 %vm407_vm0, %v328_v18  ;;  %v298_v18 = vpack.c.bf16 %v70_v7, %v69_v6  ;;  %v73_v7 = vld [vmem:[%s4445_s0 + $0x1d0] sm:$0xff] }
 0x19c   :  { %2804 = vst [vmem:[%s4447_s3 + $0x280] sm:$0xff] %v2488_v52   ;;  %2046 = vmatmul.msk.bf16.gmra.mxu2 %vm407_vm0, %v360_v19  ;;  %2078 = vmatmul.msk.bf16.gmra.mxu3 %vm407_vm0, %v392_v20  ;;  %v330_v19 = vpack.c.bf16 %v134_v11, %v133_v10  ;;  %v362_v20 = vpack.c.bf16 %v198_v13, %v197_v12  ;;  %v137_v11 = vld [vmem:[%s4445_s0 + $0x3d0] sm:$0xff]  ;;  %v138_v12 = vld [vmem:[%s4445_s0 + $0x3d8] sm:$0xff] }
 0x19d   :  { %2836 = vst [vmem:[%s4447_s3 + $0x380] sm:$0xff] %v2648_v27   ;;  %v201_v13 = vld [vmem:[%s4445_s0 + $0x5d0] sm:$0xff] }
 0x19f   :  { %v1206_v28 = vpop.f32.mrf.mxu2  ;;  %v1366_v29 = vpop.f32.mrf.mxu3 }
 0x1a0   :  { %v888_v31 = vpop.f32.mrf.mxu0  ;;  %v1048_v32 = vpop.f32.mrf.mxu1  ;;  %v1207_v54 = vadd.f32 %v3777_v30, %v1206_v28  ;;  %v1367_v55 = vadd.f32 %v3777_v30, %v1366_v29 }
 0x1a1   :  { %v889_v35 = vadd.f32 %v3777_v30, %v888_v31  ;;  %v1049_v36 = vadd.f32 %v3777_v30, %v1048_v32 }
 0x1a3   :  { %v2173_v39 = vpack.c.bf16 %v889_v35, %v887_v33  ;;  %v2333_v40 = vpack.c.bf16 %v1049_v36, %v1047_v34 }
 0x1a5   :  { %2741 = vst [vmem:[%s4447_s3 + $0x88] sm:$0xff] %v2173_v39   ;;  %v72_v39 = vld [vmem:[%s4445_s0 + $0x1c8] sm:$0xff] }
 0x1a6   :  { %2773 = vst [vmem:[%s4447_s3 + $0x188] sm:$0xff] %v2333_v40  }
 0x1a7   :  { %v1208_v47 = vpop.f32.mrf.mxu2  ;;  %v1368_v48 = vpop.f32.mrf.mxu3 }
 0x1a8   :  { %v1209_v56 = vadd.f32 %v3777_v30, %v1208_v47  ;;  %v1369_v57 = vadd.f32 %v3777_v30, %v1368_v48  ;;  %v891_v58 = vpop.f32.mrf.mxu0  ;;  %v1051_v59 = vpop.f32.mrf.mxu1  ;;  %v264_v47 = vld [vmem:[%s4445_s0 + $0x7c8] sm:$0xff] }
 0x1a9   :  { %v892_v2 = vadd.f32 %v3777_v30, %v891_v58  ;;  %v1052_v3 = vadd.f32 %v3777_v30, %v1051_v59 }
 0x1aa   :  { %v2493_v60 = vpack.c.bf16 %v1209_v56, %v1207_v54  ;;  %v2653_v61 = vpack.c.bf16 %v1369_v57, %v1367_v55  ;;  %v395_v54 = vpack.c.bf16 %v264_v47, %v263_v46  ;;  %v204_v46 = vld [vmem:[%s4445_s0 + $0x5e8] sm:$0xff]  ;;  %v267_v47 = vld [vmem:[%s4445_s0 + $0x7e0] sm:$0xff] }
 0x1ab   :  { %1983 = vmatmul.msk.bf16.gmra.mxu0 %vm407_vm0, %v297_v49  ;;  %2015 = vmatmul.msk.bf16.gmra.mxu1 %vm407_vm0, %v329_v50  ;;  %v299_v50 = vpack.c.bf16 %v72_v39, %v71_v38  ;;  %v75_v39 = vld [vmem:[%s4445_s0 + $0x1e0] sm:$0xff] }
 0x1ac   :  { %2805 = vst [vmem:[%s4447_s3 + $0x288] sm:$0xff] %v2493_v60   ;;  %2047 = vmatmul.msk.bf16.gmra.mxu2 %vm407_vm0, %v361_v51  ;;  %2079 = vmatmul.msk.bf16.gmra.mxu3 %vm407_vm0, %v393_v53  ;;  %v331_v51 = vpack.c.bf16 %v136_v43, %v135_v42  ;;  %v363_v53 = vpack.c.bf16 %v200_v45, %v199_v44  ;;  %v139_v43 = vld [vmem:[%s4445_s0 + $0x3e0] sm:$0xff]  ;;  %v140_v44 = vld [vmem:[%s4445_s0 + $0x3e8] sm:$0xff] }
 0x1ad   :  { %2837 = vst [vmem:[%s4447_s3 + $0x388] sm:$0xff] %v2653_v61   ;;  %v203_v45 = vld [vmem:[%s4445_s0 + $0x5e0] sm:$0xff] }
 0x1af   :  { %v1211_v62 = vpop.f32.mrf.mxu2  ;;  %v1371_v63 = vpop.f32.mrf.mxu3 }
 0x1b0   :  { %v893_v0 = vpop.f32.mrf.mxu0  ;;  %v1053_v1 = vpop.f32.mrf.mxu1  ;;  %v1212_v22 = vadd.f32 %v3777_v30, %v1211_v62  ;;  %v1372_v23 = vadd.f32 %v3777_v30, %v1371_v63 }
 0x1b1   :  { %v894_v4 = vadd.f32 %v3777_v30, %v893_v0  ;;  %v1054_v5 = vadd.f32 %v3777_v30, %v1053_v1 }
 0x1b3   :  { %v2178_v8 = vpack.c.bf16 %v894_v4, %v892_v2  ;;  %v2338_v9 = vpack.c.bf16 %v1054_v5, %v1052_v3 }
 0x1b5   :  { %2742 = vst [vmem:[%s4447_s3 + $0x90] sm:$0xff] %v2178_v8   ;;  %v74_v8 = vld [vmem:[%s4445_s0 + $0x1d8] sm:$0xff] }
 0x1b6   :  { %2774 = vst [vmem:[%s4447_s3 + $0x190] sm:$0xff] %v2338_v9  }
 0x1b7   :  { %v1213_v16 = vpop.f32.mrf.mxu2  ;;  %v1373_v17 = vpop.f32.mrf.mxu3 }
 0x1b8   :  { %v1214_v24 = vadd.f32 %v3777_v30, %v1213_v16  ;;  %v1374_v25 = vadd.f32 %v3777_v30, %v1373_v17  ;;  %v896_v26 = vpop.f32.mrf.mxu0  ;;  %v1056_v52 = vpop.f32.mrf.mxu1  ;;  %v266_v16 = vld [vmem:[%s4445_s0 + $0x7d8] sm:$0xff] }
 0x1b9   :  { %v897_v34 = vadd.f32 %v3777_v30, %v896_v26  ;;  %v1057_v35 = vadd.f32 %v3777_v30, %v1056_v52 }
 0x1ba   :  { %v2498_v27 = vpack.c.bf16 %v1214_v24, %v1212_v22  ;;  %v2658_v28 = vpack.c.bf16 %v1374_v25, %v1372_v23  ;;  %v396_v22 = vpack.c.bf16 %v266_v16, %v265_v15  ;;  %v206_v15 = vld [vmem:[%s4445_s0 + $0x5f8] sm:$0xff]  ;;  %v269_v16 = vld [vmem:[%s4445_s0 + $0x7f0] sm:$0xff] }
 0x1bb   :  { %1984 = vmatmul.msk.bf16.gmra.mxu0 %vm407_vm0, %v298_v18  ;;  %2016 = vmatmul.msk.bf16.gmra.mxu1 %vm407_vm0, %v330_v19  ;;  %v300_v19 = vpack.c.bf16 %v74_v8, %v73_v7  ;;  %v77_v8 = vld [vmem:[%s4445_s0 + $0x1f0] sm:$0xff] }
 0x1bc   :  { %2806 = vst [vmem:[%s4447_s3 + $0x290] sm:$0xff] %v2498_v27   ;;  %2048 = vmatmul.msk.bf16.gmra.mxu2 %vm407_vm0, %v362_v20  ;;  %2080 = vmatmul.msk.bf16.gmra.mxu3 %vm407_vm0, %v394_v21  ;;  %v332_v20 = vpack.c.bf16 %v138_v12, %v137_v11  ;;  %v364_v21 = vpack.c.bf16 %v202_v14, %v201_v13  ;;  %v141_v12 = vld [vmem:[%s4445_s0 + $0x3f0] sm:$0xff]  ;;  %v142_v13 = vld [vmem:[%s4445_s0 + $0x3f8] sm:$0xff] }
 0x1bd   :  { %2838 = vst [vmem:[%s4447_s3 + $0x390] sm:$0xff] %v2658_v28   ;;  %v205_v14 = vld [vmem:[%s4445_s0 + $0x5f0] sm:$0xff] }
 0x1bf   :  { %v1216_v29 = vpop.f32.mrf.mxu2  ;;  %v1376_v31 = vpop.f32.mrf.mxu3 }
 0x1c0   :  { %v898_v32 = vpop.f32.mrf.mxu0  ;;  %v1058_v33 = vpop.f32.mrf.mxu1  ;;  %v1217_v55 = vadd.f32 %v3777_v30, %v1216_v29  ;;  %v1377_v56 = vadd.f32 %v3777_v30, %v1376_v31 }
 0x1c1   :  { %v899_v36 = vadd.f32 %v3777_v30, %v898_v32  ;;  %v1059_v37 = vadd.f32 %v3777_v30, %v1058_v33 }
 0x1c3   :  { %v2183_v40 = vpack.c.bf16 %v899_v36, %v897_v34  ;;  %v2343_v41 = vpack.c.bf16 %v1059_v37, %v1057_v35 }
 0x1c5   :  { %2743 = vst [vmem:[%s4447_s3 + $0x98] sm:$0xff] %v2183_v40   ;;  %v76_v40 = vld [vmem:[%s4445_s0 + $0x1e8] sm:$0xff] }
 0x1c6   :  { %2775 = vst [vmem:[%s4447_s3 + $0x198] sm:$0xff] %v2343_v41  }
 0x1c7   :  { %v1218_v48 = vpop.f32.mrf.mxu2  ;;  %v1378_v49 = vpop.f32.mrf.mxu3 }
 0x1c8   :  { %v1219_v57 = vadd.f32 %v3777_v30, %v1218_v48  ;;  %v1379_v58 = vadd.f32 %v3777_v30, %v1378_v49  ;;  %v901_v59 = vpop.f32.mrf.mxu0  ;;  %v1061_v60 = vpop.f32.mrf.mxu1  ;;  %v268_v48 = vld [vmem:[%s4445_s0 + $0x7e8] sm:$0xff] }
 0x1c9   :  { %v902_v3 = vadd.f32 %v3777_v30, %v901_v59  ;;  %v1062_v4 = vadd.f32 %v3777_v30, %v1061_v60 }
 0x1ca   :  { %v2503_v61 = vpack.c.bf16 %v1219_v57, %v1217_v55  ;;  %v2663_v62 = vpack.c.bf16 %v1379_v58, %v1377_v56  ;;  %v397_v55 = vpack.c.bf16 %v268_v48, %v267_v47 }
 0x1cb   :  { %1985 = vmatmul.msk.bf16.gmra.mxu0 %vm407_vm0, %v299_v50  ;;  %2017 = vmatmul.msk.bf16.gmra.mxu1 %vm407_vm0, %v331_v51  ;;  %v301_v51 = vpack.c.bf16 %v76_v40, %v75_v39 }
 0x1cc   :  { %2807 = vst [vmem:[%s4447_s3 + $0x298] sm:$0xff] %v2503_v61   ;;  %2049 = vmatmul.msk.bf16.gmra.mxu2 %vm407_vm0, %v363_v53  ;;  %2081 = vmatmul.msk.bf16.gmra.mxu3 %vm407_vm0, %v395_v54  ;;  %v333_v53 = vpack.c.bf16 %v140_v44, %v139_v43  ;;  %v365_v54 = vpack.c.bf16 %v204_v46, %v203_v45 }
 0x1cd   :  { %2839 = vst [vmem:[%s4447_s3 + $0x398] sm:$0xff] %v2663_v62  }
 0x1cf   :  { %v1221_v63 = vpop.f32.mrf.mxu2  ;;  %v1381_v0 = vpop.f32.mrf.mxu3 }
 0x1d0   :  { %v903_v1 = vpop.f32.mrf.mxu0  ;;  %v1063_v2 = vpop.f32.mrf.mxu1  ;;  %v1222_v23 = vadd.f32 %v3777_v30, %v1221_v63  ;;  %v1382_v24 = vadd.f32 %v3777_v30, %v1381_v0 }
 0x1d1   :  { %v904_v5 = vadd.f32 %v3777_v30, %v903_v1  ;;  %v1064_v6 = vadd.f32 %v3777_v30, %v1063_v2 }
 0x1d3   :  { %v2188_v9 = vpack.c.bf16 %v904_v5, %v902_v3  ;;  %v2348_v10 = vpack.c.bf16 %v1064_v6, %v1062_v4 }
 0x1d5   :  { %2744 = vst [vmem:[%s4447_s3 + $0xa0] sm:$0xff] %v2188_v9   ;;  %v78_v9 = vld [vmem:[%s4445_s0 + $0x1f8] sm:$0xff] }
 0x1d6   :  { %2776 = vst [vmem:[%s4447_s3 + $0x1a0] sm:$0xff] %v2348_v10  }
 0x1d7   :  { %v1223_v17 = vpop.f32.mrf.mxu2  ;;  %v1383_v18 = vpop.f32.mrf.mxu3 }
 0x1d8   :  { %v1224_v25 = vadd.f32 %v3777_v30, %v1223_v17  ;;  %v1384_v26 = vadd.f32 %v3777_v30, %v1383_v18  ;;  %v906_v52 = vpop.f32.mrf.mxu0  ;;  %v1066_v27 = vpop.f32.mrf.mxu1  ;;  %v270_v17 = vld [vmem:[%s4445_s0 + $0x7f8] sm:$0xff] }
 0x1d9   :  { %v907_v35 = vadd.f32 %v3777_v30, %v906_v52  ;;  %v1067_v36 = vadd.f32 %v3777_v30, %v1066_v27 }
 0x1da   :  { %v2508_v28 = vpack.c.bf16 %v1224_v25, %v1222_v23  ;;  %v2668_v29 = vpack.c.bf16 %v1384_v26, %v1382_v24  ;;  %v398_v23 = vpack.c.bf16 %v270_v17, %v269_v16 }
 0x1db   :  { %1986 = vmatmul.msk.bf16.gmra.mxu0 %vm407_vm0, %v300_v19  ;;  %2018 = vmatmul.msk.bf16.gmra.mxu1 %vm407_vm0, %v332_v20  ;;  %v302_v20 = vpack.c.bf16 %v78_v9, %v77_v8 }
 0x1dc   :  { %2808 = vst [vmem:[%s4447_s3 + $0x2a0] sm:$0xff] %v2508_v28   ;;  %2050 = vmatmul.msk.bf16.gmra.mxu2 %vm407_vm0, %v364_v21  ;;  %2082 = vmatmul.msk.bf16.gmra.mxu3 %vm407_vm0, %v396_v22  ;;  %v334_v21 = vpack.c.bf16 %v142_v13, %v141_v12  ;;  %v366_v22 = vpack.c.bf16 %v206_v15, %v205_v14 }
 0x1dd   :  { %2840 = vst [vmem:[%s4447_s3 + $0x3a0] sm:$0xff] %v2668_v29  }
 0x1df   :  { %v1226_v31 = vpop.f32.mrf.mxu2  ;;  %v1386_v32 = vpop.f32.mrf.mxu3 }
 0x1e0   :  { %v908_v33 = vpop.f32.mrf.mxu0  ;;  %v1068_v34 = vpop.f32.mrf.mxu1  ;;  %v1227_v56 = vadd.f32 %v3777_v30, %v1226_v31  ;;  %v1387_v57 = vadd.f32 %v3777_v30, %v1386_v32 }
 0x1e1   :  { %v909_v37 = vadd.f32 %v3777_v30, %v908_v33  ;;  %v1069_v38 = vadd.f32 %v3777_v30, %v1068_v34 }
 0x1e3   :  { %v2193_v41 = vpack.c.bf16 %v909_v37, %v907_v35  ;;  %v2353_v42 = vpack.c.bf16 %v1069_v38, %v1067_v36 }
 0x1e5   :  { %2745 = vst [vmem:[%s4447_s3 + $0xa8] sm:$0xff] %v2193_v41  }
 0x1e6   :  { %2777 = vst [vmem:[%s4447_s3 + $0x1a8] sm:$0xff] %v2353_v42  }
 0x1e7   :  { %v1228_v49 = vpop.f32.mrf.mxu2  ;;  %v1388_v50 = vpop.f32.mrf.mxu3 }
 0x1e8   :  { %v1229_v58 = vadd.f32 %v3777_v30, %v1228_v49  ;;  %v1389_v59 = vadd.f32 %v3777_v30, %v1388_v50  ;;  %v911_v60 = vpop.f32.mrf.mxu0  ;;  %v1071_v61 = vpop.f32.mrf.mxu1 }
 0x1e9   :  { %v912_v4 = vadd.f32 %v3777_v30, %v911_v60  ;;  %v1072_v5 = vadd.f32 %v3777_v30, %v1071_v61 }
 0x1ea   :  { %v2513_v62 = vpack.c.bf16 %v1229_v58, %v1227_v56  ;;  %v2673_v63 = vpack.c.bf16 %v1389_v59, %v1387_v57 }
 0x1eb   :  { %1987 = vmatmul.msk.bf16.gmra.mxu0 %vm407_vm0, %v301_v51  ;;  %2019 = vmatmul.msk.bf16.gmra.mxu1 %vm407_vm0, %v333_v53 }
 0x1ec   :  { %2809 = vst [vmem:[%s4447_s3 + $0x2a8] sm:$0xff] %v2513_v62   ;;  %2051 = vmatmul.msk.bf16.gmra.mxu2 %vm407_vm0, %v365_v54  ;;  %2083 = vmatmul.msk.bf16.gmra.mxu3 %vm407_vm0, %v397_v55 }
 0x1ed   :  { %2841 = vst [vmem:[%s4447_s3 + $0x3a8] sm:$0xff] %v2673_v63  }
 0x1ef   :  { %v1231_v0 = vpop.f32.mrf.mxu2  ;;  %v1391_v1 = vpop.f32.mrf.mxu3 }
 0x1f0   :  { %v913_v2 = vpop.f32.mrf.mxu0  ;;  %v1073_v3 = vpop.f32.mrf.mxu1  ;;  %v1232_v24 = vadd.f32 %v3777_v30, %v1231_v0  ;;  %v1392_v25 = vadd.f32 %v3777_v30, %v1391_v1 }
 0x1f1   :  { %v914_v6 = vadd.f32 %v3777_v30, %v913_v2  ;;  %v1074_v7 = vadd.f32 %v3777_v30, %v1073_v3 }
 0x1f3   :  { %v2198_v10 = vpack.c.bf16 %v914_v6, %v912_v4  ;;  %v2358_v11 = vpack.c.bf16 %v1074_v7, %v1072_v5 }
 0x1f5   :  { %2746 = vst [vmem:[%s4447_s3 + $0xb0] sm:$0xff] %v2198_v10  }
 0x1f6   :  { %2778 = vst [vmem:[%s4447_s3 + $0x1b0] sm:$0xff] %v2358_v11  }
 0x1f7   :  { %v1233_v18 = vpop.f32.mrf.mxu2  ;;  %v1393_v19 = vpop.f32.mrf.mxu3 }
 0x1f8   :  { %v1234_v26 = vadd.f32 %v3777_v30, %v1233_v18  ;;  %v1394_v52 = vadd.f32 %v3777_v30, %v1393_v19  ;;  %v916_v27 = vpop.f32.mrf.mxu0  ;;  %v1076_v28 = vpop.f32.mrf.mxu1 }
 0x1f9   :  { %v917_v36 = vadd.f32 %v3777_v30, %v916_v27  ;;  %v1077_v37 = vadd.f32 %v3777_v30, %v1076_v28 }
 0x1fa   :  { %v2518_v29 = vpack.c.bf16 %v1234_v26, %v1232_v24  ;;  %v2678_v31 = vpack.c.bf16 %v1394_v52, %v1392_v25 }
 0x1fb   :  { %1988 = vmatmul.msk.bf16.gmra.mxu0 %vm407_vm0, %v302_v20  ;;  %2020 = vmatmul.msk.bf16.gmra.mxu1 %vm407_vm0, %v334_v21 }
 0x1fc   :  { %2810 = vst [vmem:[%s4447_s3 + $0x2b0] sm:$0xff] %v2518_v29   ;;  %2052 = vmatmul.msk.bf16.gmra.mxu2 %vm407_vm0, %v366_v22  ;;  %2084 = vmatmul.msk.bf16.gmra.mxu3 %vm407_vm0, %v398_v23 }
 0x1fd   :  { %2842 = vst [vmem:[%s4447_s3 + $0x3b0] sm:$0xff] %v2678_v31  }
 0x1ff   :  { %v1236_v32 = vpop.f32.mrf.mxu2  ;;  %v1396_v33 = vpop.f32.mrf.mxu3 }
 0x200   :  { %v918_v34 = vpop.f32.mrf.mxu0  ;;  %v1078_v35 = vpop.f32.mrf.mxu1  ;;  %v1237_v44 = vadd.f32 %v3777_v30, %v1236_v32  ;;  %v1397_v45 = vadd.f32 %v3777_v30, %v1396_v33 }
 0x201   :  { %v919_v38 = vadd.f32 %v3777_v30, %v918_v34  ;;  %v1079_v39 = vadd.f32 %v3777_v30, %v1078_v35 }
 0x203   :  { %v2203_v40 = vpack.c.bf16 %v919_v38, %v917_v36  ;;  %v2363_v41 = vpack.c.bf16 %v1079_v39, %v1077_v37 }
 0x205   :  { %2747 = vst [vmem:[%s4447_s3 + $0xb8] sm:$0xff] %v2203_v40  }
 0x206   :  { %2779 = vst [vmem:[%s4447_s3 + $0x1b8] sm:$0xff] %v2363_v41  }
 0x207   :  { %v1238_v42 = vpop.f32.mrf.mxu2  ;;  %v1398_v43 = vpop.f32.mrf.mxu3 }
 0x208   :  { %v1239_v46 = vadd.f32 %v3777_v30, %v1238_v42  ;;  %v1399_v47 = vadd.f32 %v3777_v30, %v1398_v43  ;;  %v921_v48 = vpop.f32.mrf.mxu0  ;;  %v1081_v49 = vpop.f32.mrf.mxu1 }
 0x209   :  { %v922_v57 = vadd.f32 %v3777_v30, %v921_v48  ;;  %v1082_v58 = vadd.f32 %v3777_v30, %v1081_v49 }
 0x20a   :  { %v2523_v50 = vpack.c.bf16 %v1239_v46, %v1237_v44  ;;  %v2683_v51 = vpack.c.bf16 %v1399_v47, %v1397_v45 }
 0x20c   :  { %2811 = vst [vmem:[%s4447_s3 + $0x2b8] sm:$0xff] %v2523_v50  }
 0x20d   :  { %2843 = vst [vmem:[%s4447_s3 + $0x3b8] sm:$0xff] %v2683_v51  }
 0x20f   :  { %v1241_v53 = vpop.f32.mrf.mxu2  ;;  %v1401_v54 = vpop.f32.mrf.mxu3 }
 0x210   :  { %v923_v55 = vpop.f32.mrf.mxu0  ;;  %v1083_v56 = vpop.f32.mrf.mxu1  ;;  %v1242_v1 = vadd.f32 %v3777_v30, %v1241_v53  ;;  %v1402_v2 = vadd.f32 %v3777_v30, %v1401_v54 }
 0x211   :  { %v924_v59 = vadd.f32 %v3777_v30, %v923_v55  ;;  %v1084_v60 = vadd.f32 %v3777_v30, %v1083_v56 }
 0x213   :  { %v2208_v61 = vpack.c.bf16 %v924_v59, %v922_v57  ;;  %v2368_v62 = vpack.c.bf16 %v1084_v60, %v1082_v58 }
 0x215   :  { %2748 = vst [vmem:[%s4447_s3 + $0xc0] sm:$0xff] %v2208_v61  }
 0x216   :  { %2780 = vst [vmem:[%s4447_s3 + $0x1c0] sm:$0xff] %v2368_v62  }
 0x217   :  { %v1243_v63 = vpop.f32.mrf.mxu2  ;;  %v1403_v0 = vpop.f32.mrf.mxu3 }
 0x218   :  { %v1244_v3 = vadd.f32 %v3777_v30, %v1243_v63  ;;  %v1404_v4 = vadd.f32 %v3777_v30, %v1403_v0  ;;  %v926_v5 = vpop.f32.mrf.mxu0  ;;  %v1086_v6 = vpop.f32.mrf.mxu1 }
 0x219   :  { %v927_v13 = vadd.f32 %v3777_v30, %v926_v5  ;;  %v1087_v14 = vadd.f32 %v3777_v30, %v1086_v6 }
 0x21a   :  { %v2528_v7 = vpack.c.bf16 %v1244_v3, %v1242_v1  ;;  %v2688_v8 = vpack.c.bf16 %v1404_v4, %v1402_v2 }
 0x21c   :  { %2812 = vst [vmem:[%s4447_s3 + $0x2c0] sm:$0xff] %v2528_v7  }
 0x21d   :  { %2844 = vst [vmem:[%s4447_s3 + $0x3c0] sm:$0xff] %v2688_v8  }
 0x21f   :  { %v1246_v9 = vpop.f32.mrf.mxu2  ;;  %v1406_v10 = vpop.f32.mrf.mxu3 }
 0x220   :  { %v928_v11 = vpop.f32.mrf.mxu0  ;;  %v1088_v12 = vpop.f32.mrf.mxu1  ;;  %v1247_v21 = vadd.f32 %v3777_v30, %v1246_v9  ;;  %v1407_v22 = vadd.f32 %v3777_v30, %v1406_v10 }
 0x221   :  { %v929_v15 = vadd.f32 %v3777_v30, %v928_v11  ;;  %v1089_v16 = vadd.f32 %v3777_v30, %v1088_v12 }
 0x223   :  { %v2213_v17 = vpack.c.bf16 %v929_v15, %v927_v13  ;;  %v2373_v18 = vpack.c.bf16 %v1089_v16, %v1087_v14 }
 0x225   :  { %2749 = vst [vmem:[%s4447_s3 + $0xc8] sm:$0xff] %v2213_v17  }
 0x226   :  { %2781 = vst [vmem:[%s4447_s3 + $0x1c8] sm:$0xff] %v2373_v18  }
 0x227   :  { %v1248_v19 = vpop.f32.mrf.mxu2  ;;  %v1408_v20 = vpop.f32.mrf.mxu3 }
 0x228   :  { %v1249_v23 = vadd.f32 %v3777_v30, %v1248_v19  ;;  %v1409_v24 = vadd.f32 %v3777_v30, %v1408_v20  ;;  %v931_v25 = vpop.f32.mrf.mxu0  ;;  %v1091_v26 = vpop.f32.mrf.mxu1 }
 0x229   :  { %v932_v33 = vadd.f32 %v3777_v30, %v931_v25  ;;  %v1092_v34 = vadd.f32 %v3777_v30, %v1091_v26 }
 0x22a   :  { %v2533_v52 = vpack.c.bf16 %v1249_v23, %v1247_v21  ;;  %v2693_v27 = vpack.c.bf16 %v1409_v24, %v1407_v22 }
 0x22c   :  { %2813 = vst [vmem:[%s4447_s3 + $0x2c8] sm:$0xff] %v2533_v52  }
 0x22d   :  { %2845 = vst [vmem:[%s4447_s3 + $0x3c8] sm:$0xff] %v2693_v27  }
 0x22f   :  { %v1251_v28 = vpop.f32.mrf.mxu2  ;;  %v1411_v29 = vpop.f32.mrf.mxu3 }
 0x230   :  { %v933_v31 = vpop.f32.mrf.mxu0  ;;  %v1093_v32 = vpop.f32.mrf.mxu1  ;;  %v1252_v41 = vadd.f32 %v3777_v30, %v1251_v28  ;;  %v1412_v42 = vadd.f32 %v3777_v30, %v1411_v29 }
 0x231   :  { %v934_v35 = vadd.f32 %v3777_v30, %v933_v31  ;;  %v1094_v36 = vadd.f32 %v3777_v30, %v1093_v32 }
 0x233   :  { %v2218_v37 = vpack.c.bf16 %v934_v35, %v932_v33  ;;  %v2378_v38 = vpack.c.bf16 %v1094_v36, %v1092_v34 }
 0x235   :  { %2750 = vst [vmem:[%s4447_s3 + $0xd0] sm:$0xff] %v2218_v37  }
 0x236   :  { %2782 = vst [vmem:[%s4447_s3 + $0x1d0] sm:$0xff] %v2378_v38  }
 0x237   :  { %v1253_v39 = vpop.f32.mrf.mxu2  ;;  %v1413_v40 = vpop.f32.mrf.mxu3 }
 0x238   :  { %v1254_v43 = vadd.f32 %v3777_v30, %v1253_v39  ;;  %v1414_v44 = vadd.f32 %v3777_v30, %v1413_v40  ;;  %v936_v45 = vpop.f32.mrf.mxu0  ;;  %v1096_v46 = vpop.f32.mrf.mxu1 }
 0x239   :  { %v937_v54 = vadd.f32 %v3777_v30, %v936_v45  ;;  %v1097_v55 = vadd.f32 %v3777_v30, %v1096_v46 }
 0x23a   :  { %v2538_v47 = vpack.c.bf16 %v1254_v43, %v1252_v41  ;;  %v2698_v48 = vpack.c.bf16 %v1414_v44, %v1412_v42 }
 0x23c   :  { %2814 = vst [vmem:[%s4447_s3 + $0x2d0] sm:$0xff] %v2538_v47  }
 0x23d   :  { %2846 = vst [vmem:[%s4447_s3 + $0x3d0] sm:$0xff] %v2698_v48  }
 0x23f   :  { %v1256_v49 = vpop.f32.mrf.mxu2  ;;  %v1416_v50 = vpop.f32.mrf.mxu3 }
 0x240   :  { %v938_v51 = vpop.f32.mrf.mxu0  ;;  %v1098_v53 = vpop.f32.mrf.mxu1  ;;  %v1257_v62 = vadd.f32 %v3777_v30, %v1256_v49  ;;  %v1417_v63 = vadd.f32 %v3777_v30, %v1416_v50 }
 0x241   :  { %v939_v56 = vadd.f32 %v3777_v30, %v938_v51  ;;  %v1099_v57 = vadd.f32 %v3777_v30, %v1098_v53 }
 0x243   :  { %v2223_v58 = vpack.c.bf16 %v939_v56, %v937_v54  ;;  %v2383_v59 = vpack.c.bf16 %v1099_v57, %v1097_v55 }
 0x245   :  { %2751 = vst [vmem:[%s4447_s3 + $0xd8] sm:$0xff] %v2223_v58  }
 0x246   :  { %2783 = vst [vmem:[%s4447_s3 + $0x1d8] sm:$0xff] %v2383_v59  }
 0x247   :  { %v1258_v60 = vpop.f32.mrf.mxu2  ;;  %v1418_v61 = vpop.f32.mrf.mxu3 }
 0x248   :  { %v1259_v0 = vadd.f32 %v3777_v30, %v1258_v60  ;;  %v1419_v1 = vadd.f32 %v3777_v30, %v1418_v61  ;;  %v941_v2 = vpop.f32.mrf.mxu0  ;;  %v1101_v3 = vpop.f32.mrf.mxu1  ;;  %v4362_v30 = vld [vmem:[%s4446_s2] ss:$0 sm:$0xff] }
 0x249   :  { %v942_v10 = vadd.f32 %v4362_v30, %v941_v2  ;;  %v1102_v11 = vadd.f32 %v4362_v30, %v1101_v3 }
 0x24a   :  { %v2543_v4 = vpack.c.bf16 %v1259_v0, %v1257_v62  ;;  %v2703_v5 = vpack.c.bf16 %v1419_v1, %v1417_v63 }
 0x24c   :  { %2815 = vst [vmem:[%s4447_s3 + $0x2d8] sm:$0xff] %v2543_v4  }
 0x24d   :  { %2847 = vst [vmem:[%s4447_s3 + $0x3d8] sm:$0xff] %v2703_v5  }
 0x24f   :  { %v1261_v6 = vpop.f32.mrf.mxu2  ;;  %v1421_v7 = vpop.f32.mrf.mxu3 }
 0x250   :  { %v943_v8 = vpop.f32.mrf.mxu0  ;;  %v1103_v9 = vpop.f32.mrf.mxu1  ;;  %v1262_v18 = vadd.f32 %v4362_v30, %v1261_v6  ;;  %v1422_v19 = vadd.f32 %v4362_v30, %v1421_v7 }
 0x251   :  { %v944_v12 = vadd.f32 %v4362_v30, %v943_v8  ;;  %v1104_v13 = vadd.f32 %v4362_v30, %v1103_v9 }
 0x253   :  { %v2228_v14 = vpack.c.bf16 %v944_v12, %v942_v10  ;;  %v2388_v15 = vpack.c.bf16 %v1104_v13, %v1102_v11 }
 0x255   :  { %2752 = vst [vmem:[%s4447_s3 + $0xe0] sm:$0xff] %v2228_v14  }
 0x256   :  { %2784 = vst [vmem:[%s4447_s3 + $0x1e0] sm:$0xff] %v2388_v15  }
 0x257   :  { %v1263_v16 = vpop.f32.mrf.mxu2  ;;  %v1423_v17 = vpop.f32.mrf.mxu3 }
 0x258   :  { %v1264_v20 = vadd.f32 %v4362_v30, %v1263_v16  ;;  %v1424_v21 = vadd.f32 %v4362_v30, %v1423_v17  ;;  %v946_v22 = vpop.f32.mrf.mxu0  ;;  %v1106_v23 = vpop.f32.mrf.mxu1 }
 0x259   :  { %v947_v29 = vadd.f32 %v4362_v30, %v946_v22  ;;  %v1107_v31 = vadd.f32 %v4362_v30, %v1106_v23 }
 0x25a   :  { %v2548_v24 = vpack.c.bf16 %v1264_v20, %v1262_v18  ;;  %v2708_v25 = vpack.c.bf16 %v1424_v21, %v1422_v19 }
 0x25c   :  { %2816 = vst [vmem:[%s4447_s3 + $0x2e0] sm:$0xff] %v2548_v24  }
 0x25d   :  { %2848 = vst [vmem:[%s4447_s3 + $0x3e0] sm:$0xff] %v2708_v25  }
 0x25f   :  { %v1266_v26 = vpop.f32.mrf.mxu2  ;;  %v1426_v52 = vpop.f32.mrf.mxu3 }
 0x260   :  { %v948_v27 = vpop.f32.mrf.mxu0  ;;  %v1108_v28 = vpop.f32.mrf.mxu1  ;;  %v1267_v38 = vadd.f32 %v4362_v30, %v1266_v26  ;;  %v1427_v39 = vadd.f32 %v4362_v30, %v1426_v52 }
 0x261   :  { %v949_v32 = vadd.f32 %v4362_v30, %v948_v27  ;;  %v1109_v33 = vadd.f32 %v4362_v30, %v1108_v28 }
 0x263   :  { %v2233_v34 = vpack.c.bf16 %v949_v32, %v947_v29  ;;  %v2393_v35 = vpack.c.bf16 %v1109_v33, %v1107_v31 }
 0x265   :  { %2753 = vst [vmem:[%s4447_s3 + $0xe8] sm:$0xff] %v2233_v34  }
 0x266   :  { %2785 = vst [vmem:[%s4447_s3 + $0x1e8] sm:$0xff] %v2393_v35  }
 0x267   :  { %v1268_v36 = vpop.f32.mrf.mxu2  ;;  %v1428_v37 = vpop.f32.mrf.mxu3 }
 0x268   :  { %v1269_v40 = vadd.f32 %v4362_v30, %v1268_v36  ;;  %v1429_v41 = vadd.f32 %v4362_v30, %v1428_v37  ;;  %v951_v42 = vpop.f32.mrf.mxu0  ;;  %v1111_v43 = vpop.f32.mrf.mxu1 }
 0x269   :  { %v952_v50 = vadd.f32 %v4362_v30, %v951_v42  ;;  %v1112_v51 = vadd.f32 %v4362_v30, %v1111_v43 }
 0x26a   :  { %v2553_v44 = vpack.c.bf16 %v1269_v40, %v1267_v38  ;;  %v2713_v45 = vpack.c.bf16 %v1429_v41, %v1427_v39 }
 0x26c   :  { %2817 = vst [vmem:[%s4447_s3 + $0x2e8] sm:$0xff] %v2553_v44  }
 0x26d   :  { %2849 = vst [vmem:[%s4447_s3 + $0x3e8] sm:$0xff] %v2713_v45  }
 0x26f   :  { %v1271_v46 = vpop.f32.mrf.mxu2  ;;  %v1431_v47 = vpop.f32.mrf.mxu3 }
 0x270   :  { %v953_v48 = vpop.f32.mrf.mxu0  ;;  %v1113_v49 = vpop.f32.mrf.mxu1  ;;  %v1272_v59 = vadd.f32 %v4362_v30, %v1271_v46  ;;  %v1432_v60 = vadd.f32 %v4362_v30, %v1431_v47 }
 0x271   :  { %v954_v53 = vadd.f32 %v4362_v30, %v953_v48  ;;  %v1114_v54 = vadd.f32 %v4362_v30, %v1113_v49 }
 0x273   :  { %v2238_v55 = vpack.c.bf16 %v954_v53, %v952_v50  ;;  %v2398_v56 = vpack.c.bf16 %v1114_v54, %v1112_v51 }
 0x275   :  { %2754 = vst [vmem:[%s4447_s3 + $0xf0] sm:$0xff] %v2238_v55  }
 0x276   :  { %2786 = vst [vmem:[%s4447_s3 + $0x1f0] sm:$0xff] %v2398_v56  }
 0x277   :  { %v1273_v57 = vpop.f32.mrf.mxu2  ;;  %v1433_v58 = vpop.f32.mrf.mxu3 }
 0x278   :  { %v1274_v61 = vadd.f32 %v4362_v30, %v1273_v57  ;;  %v1434_v62 = vadd.f32 %v4362_v30, %v1433_v58  ;;  %v956_v63 = vpop.f32.mrf.mxu0  ;;  %v1116_v0 = vpop.f32.mrf.mxu1 }
 0x279   :  { %v957_v7 = vadd.f32 %v4362_v30, %v956_v63  ;;  %v1117_v8 = vadd.f32 %v4362_v30, %v1116_v0 }
 0x27a   :  { %v2558_v1 = vpack.c.bf16 %v1274_v61, %v1272_v59  ;;  %v2718_v2 = vpack.c.bf16 %v1434_v62, %v1432_v60 }
 0x27c   :  { %2818 = vst [vmem:[%s4447_s3 + $0x2f0] sm:$0xff] %v2558_v1  }
 0x27d   :  { %2850 = vst [vmem:[%s4447_s3 + $0x3f0] sm:$0xff] %v2718_v2  }
 0x27f   :  { %v1276_v3 = vpop.f32.mrf.mxu2  ;;  %v1436_v4 = vpop.f32.mrf.mxu3 }
 0x280   :  { %v958_v5 = vpop.f32.mrf.mxu0  ;;  %v1118_v6 = vpop.f32.mrf.mxu1  ;;  %v1277_v15 = vadd.f32 %v4362_v30, %v1276_v3  ;;  %v1437_v16 = vadd.f32 %v4362_v30, %v1436_v4 }
 0x281   :  { %v959_v9 = vadd.f32 %v4362_v30, %v958_v5  ;;  %v1119_v10 = vadd.f32 %v4362_v30, %v1118_v6 }
 0x283   :  { %v2243_v11 = vpack.c.bf16 %v959_v9, %v957_v7  ;;  %v2403_v12 = vpack.c.bf16 %v1119_v10, %v1117_v8 }
 0x285   :  { %2755 = vst [vmem:[%s4447_s3 + $0xf8] sm:$0xff] %v2243_v11  }
 0x286   :  { %2787 = vst [vmem:[%s4447_s3 + $0x1f8] sm:$0xff] %v2403_v12  }
 0x287   :  { %v1278_v13 = vpop.f32.mrf.mxu2  ;;  %v1438_v14 = vpop.f32.mrf.mxu3 }
 0x288   :  { %v1279_v17 = vadd.f32 %v4362_v30, %v1278_v13  ;;  %v1439_v18 = vadd.f32 %v4362_v30, %v1438_v14 }
 0x28a   :  { %v2563_v19 = vpack.c.bf16 %v1279_v17, %v1277_v15  ;;  %v2723_v20 = vpack.c.bf16 %v1439_v18, %v1437_v16 }
 0x28c   :  { %2819 = vst [vmem:[%s4447_s3 + $0x2f8] sm:$0xff] %v2563_v19  }
 0x28d   :  { %2851 = vst [vmem:[%s4447_s3 + $0x3f8] sm:$0xff] %v2723_v20  }

</bundles_post_ra>
